<compile_context>
chip_gen: v7x
topology: tpu7x:2x2x1
jax: 0.10.0
libtpu: 0.0.40
codegen_flags: <defaults>
</compile_context>

<pallas_src>
import functools
import math

import jax
import jax.numpy as jnp
import numpy as np
from jax.experimental import pallas as pl
from jax.experimental.pallas import tpu as pltpu

MIN_VALUE = -1e38


def _temrwkv_kernel(x_ref, wf_ref, wo_ref, wdec_ref, ufst_ref,
                    o_ref,
                    k_s, v_s, sr_s, carry_s, p_s, q_s, o_s, *, unroll):
    Tc, Bb, C = x_ref.shape
    M = Tc * Bb
    tc = pl.program_id(1)

    # ---- per-batch-block state init (first time chunk only) ----------------
    @pl.when(tc == 0)
    def _():
        p_s[...] = jnp.zeros_like(p_s)
        q_s[...] = jnp.zeros_like(q_s)
        o_s[...] = jnp.full(o_s.shape, MIN_VALUE, dtype=o_s.dtype)
        carry_s[...] = jnp.zeros_like(carry_s)

    # ---- fused projection GEMM + time-shift mix -----------------------------
    # [k|v|r](t) = x_t @ Wa + x_{t-1} @ Wb, computed as ONE (M, C) @ (C, 6C)
    # GEMM; the time shift is a roll of the GEMM output by Bb rows (1 step).
    x = x_ref[...].reshape(M, C)
    kvr6 = jnp.dot(x, wf_ref[...], preferred_element_type=jnp.float32)  # (M, 6C)
    a_half = kvr6[:, :3 * C]                        # x_t @ Wa
    b_half = kvr6[:, 3 * C:]                        # x_t @ Wb
    b_shift = pltpu.roll(b_half, shift=Bb, axis=0)  # x_{t-1} @ Wb (rows 0..Bb wrap)
    kvr = a_half + b_shift

    k_s[...] = kvr[:, :C]
    v_s[...] = kvr[:, C:2 * C]
    sr_s[...] = jax.nn.sigmoid(kvr[:, 2 * C:])

    # First timestep of this chunk: its shifted term is the previous chunk's
    # last timestep (zero for the very first chunk), not the roll wrap-around.
    fix = a_half[:Bb, :] + carry_s[...]
    k_s[pl.ds(0, Bb), :] = fix[:, :C]
    v_s[pl.ds(0, Bb), :] = fix[:, C:2 * C]
    sr_s[pl.ds(0, Bb), :] = jax.nn.sigmoid(fix[:, 2 * C:])
    carry_s[...] = b_half[M - Bb:, :]               # carry for the next chunk

    # ---- WKV recurrence (wkv_cuda.cu forward), vectorized over batch --------
    w = jnp.broadcast_to(wdec_ref[...], (Bb, C))    # spatial_decay / T (hoisted)
    u = jnp.broadcast_to(ufst_ref[...], (Bb, C))    # spatial_first / T (hoisted)

    def block_body(bi, carry):
        p, q, o = carry
        base = bi * (unroll * Bb)
        for j in range(unroll):                     # static 8-step unroll
            off = pl.multiple_of(base + j * Bb, Bb)
            kt = k_s[pl.ds(off, Bb), :]             # full (Bb, C) tile loads
            vt = v_s[pl.ds(off, Bb), :]

            no = jnp.maximum(o, u + kt)
            A = jnp.exp(o - no)
            Bv = jnp.exp(u + kt - no)
            num = A * p + Bv * vt
            den = A * q + Bv
            r0 = pl.reciprocal(den, approx=True)    # EUP slot (cheap)
            r1 = r0 * (2.0 - den * r0)              # one Newton step -> ~f32 exact
            # y overwrites the now-dead k rows (one fewer scratch stream).
            k_s[pl.ds(off, Bb), :] = num * r1

            no2 = jnp.maximum(w + o, kt)
            A2 = jnp.exp(w + o - no2)
            B2 = jnp.exp(kt - no2)
            p = A2 * p + B2 * vt
            q = A2 * q + B2
            o = no2
        return p, q, o

    p, q, o = jax.lax.fori_loop(0, Tc // unroll, block_body,
                                (p_s[...], q_s[...], o_s[...]))
    p_s[...] = p
    q_s[...] = q
    o_s[...] = o

    # ---- receptance gate + output projection --------------------------------
    # TODO(synk): optional key_norm (LayerNorm) branch not implemented; the
    # module's default configuration has key_norm=None.
    rwkv = sr_s[...] * k_s[...]
    out = jnp.dot(rwkv, wo_ref[...], preferred_element_type=jnp.float32)
    o_ref[...] = out.reshape(Tc, Bb, C).astype(o_ref.dtype)


def temrwkv_signalmix(x, params, *, tc_target=128):
    """x: (B, T, C) float32.  params: dict of jnp arrays (see make_params)."""
    B, T, C = x.shape
    orig_dtype = x.dtype

    # Fuse the spatial-mix coefficients into one (C, 6C) projection weight.
    mk = params["spatial_mix_k"].reshape(C)
    mv = params["spatial_mix_v"].reshape(C)
    mr = params["spatial_mix_r"].reshape(C)
    wk, wv, wr, wo = params["wk"], params["wv"], params["wr"], params["wo"]
    wa = jnp.concatenate(
        [wk * mk[:, None], wv * mv[:, None], wr * mr[:, None]], axis=1)
    wb = jnp.concatenate(
        [wk * (1.0 - mk)[:, None], wv * (1.0 - mv)[:, None],
         wr * (1.0 - mr)[:, None]], axis=1)
    w_fused = jnp.concatenate([wa, wb], axis=1).astype(jnp.float32)   # (C, 6C)

    wdec = (params["spatial_decay"] / T).reshape(1, C).astype(jnp.float32)
    ufst = (params["spatial_first"] / T).reshape(1, C).astype(jnp.float32)

    # Batch tiling: 16 fills the GEMM M dim (Tc*16 multiple of 128) and gives
    # two independent vreg lanes per recurrence op; 8 for wide C (vreg budget).
    b_blk = 16 if C <= 128 else 8
    pad_b = (-B) % b_blk
    Bp = B + pad_b
    nb = Bp // b_blk
    # NOTE: on v7x keep nb >= 2 (both TensorCores) -- grid axis 0 is "parallel".

    # Time tiling: pad T so the 8-step unroll never needs a masked tail, then
    # split into ~tc_target-step chunks (bounds VMEM independent of T).
    unroll = 8
    tc_target = max(int(tc_target), unroll)
    t_pad8 = -(-T // unroll) * unroll
    n_tc = max(1, -(-t_pad8 // tc_target))
    Tc = -(-(-(-t_pad8 // n_tc)) // unroll) * unroll
    Tp = Tc * n_tc

    if pad_b or Tp != T:
        x = jnp.pad(x, ((0, pad_b), (0, Tp - T), (0, 0)))
    # Time-major so every per-timestep slab is a contiguous full-tile (Bb, C).
    # (Remaining HBM optimization per review: fuse this transpose and the one
    #  on the output into the neighboring layers; kept explicit here.)
    x_tm = jnp.transpose(x, (1, 0, 2)).astype(jnp.float32)     # (Tp, Bp, C)

    M = Tc * b_blk

    in_specs = [
        pl.BlockSpec((Tc, b_blk, C), lambda i, tc: (tc, i, 0)),       # x chunk
        pl.BlockSpec((C, 6 * C), lambda i, tc: (0, 0),
                     pipeline_mode=pl.Buffered(1)),                   # fused W
        pl.BlockSpec((C, C), lambda i, tc: (0, 0),
                     pipeline_mode=pl.Buffered(1)),                   # Wo
        pl.BlockSpec((1, C), lambda i, tc: (0, 0),
                     pipeline_mode=pl.Buffered(1)),                   # decay / T
        pl.BlockSpec((1, C), lambda i, tc: (0, 0),
                     pipeline_mode=pl.Buffered(1)),                   # first / T
    ]
    out_specs = pl.BlockSpec((Tc, b_blk, C), lambda i, tc: (tc, i, 0))
    scratch_shapes = [
        pltpu.VMEM((M, C), jnp.float32),            # k, overwritten by y
        pltpu.VMEM((M, C), jnp.float32),            # v
        pltpu.VMEM((M, C), jnp.float32),            # sigmoid(r)
        pltpu.VMEM((b_blk, 3 * C), jnp.float32),    # time-shift carry
        pltpu.VMEM((b_blk, C), jnp.float32),        # p
        pltpu.VMEM((b_blk, C), jnp.float32),        # q
        pltpu.VMEM((b_blk, C), jnp.float32),        # o
    ]

    # VMEM budget (per review: derive explicitly; only override the scoped
    # default when the estimate actually needs it).
    blk = Tc * b_blk * C * 4
    est = (4 * blk                       # double-buffered x in + out blocks
           + 3 * blk                     # k / v / sr scratch
           + 12 * blk                    # (M, 6C) fused-GEMM intermediate x2
           + (7 * C * C + 2 * C) * 4     # single-buffered weights
           + 10 * b_blk * C * 4)         # carried state
    vmem_limit = int(est * 1.25) if est > (24 << 20) else None

    out_tm = pl.pallas_call(
        functools.partial(_temrwkv_kernel, unroll=unroll),
        out_shape=jax.ShapeDtypeStruct((Tp, Bp, C), jnp.float32),
        grid_spec=pltpu.PrefetchScalarGridSpec(
            num_scalar_prefetch=0,
            grid=(nb, n_tc),
            in_specs=in_specs,
            out_specs=out_specs,
            scratch_shapes=scratch_shapes),
        compiler_params=pltpu.CompilerParams(
            dimension_semantics=("parallel", "arbitrary"),
            vmem_limit_bytes=vmem_limit),
    )(x_tm, w_fused, wo, wdec, ufst)

    out = jnp.transpose(out_tm, (1, 0, 2))[:B, :T, :]
    return out.astype(orig_dtype)


# ----------------------------------------------------------------------------
# Deterministic parameter construction (replicates _init_weights('fancy')).
# ----------------------------------------------------------------------------
def make_params(n_embd, n_layer, layer_id, key):
    C = n_embd
    ratio_0_to_1 = layer_id / (n_layer - 1)
    ratio_1_to_almost0 = 1.0 - layer_id / n_layer

    h = np.arange(C, dtype=np.float64)
    decay_speed = -5.0 + 8.0 * (h / (C - 1)) ** (0.7 + 1.3 * ratio_0_to_1)
    zigzag = np.array([(i + 1) % 3 - 1 for i in range(C)], dtype=np.float64) * 0.5
    spatial_first = np.ones(C) * math.log(0.3) + zigzag

    xinit = np.arange(C, dtype=np.float64) / C
    mix_k = xinit ** ratio_1_to_almost0
    mix_v = xinit ** ratio_1_to_almost0 + 0.3 * ratio_0_to_1
    mix_r = xinit ** (0.5 * ratio_1_to_almost0)

    kk, kv, kr, ko = jax.random.split(key, 4)
    scale = 0.02
    # Linear weights stored pre-transposed: (C_in, C_out).
    wk = jax.random.normal(kk, (C, C), jnp.float32) * scale
    wv = jax.random.normal(kv, (C, C), jnp.float32) * scale
    wr = jax.random.normal(kr, (C, C), jnp.float32) * scale
    wo = jax.random.normal(ko, (C, C), jnp.float32) * scale

    return {
        "spatial_decay": jnp.asarray(decay_speed, jnp.float32).reshape(1, C),
        "spatial_first": jnp.asarray(spatial_first, jnp.float32).reshape(1, C),
        "spatial_mix_k": jnp.asarray(mix_k, jnp.float32).reshape(1, C),
        "spatial_mix_v": jnp.asarray(mix_v, jnp.float32).reshape(1, C),
        "spatial_mix_r": jnp.asarray(mix_r, jnp.float32).reshape(1, C),
        "wk": wk, "wv": wv, "wr": wr, "wo": wo,
    }


# ----------------------------------------------------------------------------
# Pure-JAX reference (mirrors the PyTorch forward + wkv_cuda.cu forward).
# ----------------------------------------------------------------------------
def reference_forward(x, params):
    B, T, C = x.shape
    xx = jnp.concatenate([jnp.zeros((B, 1, C), x.dtype), x[:, :-1, :]], axis=1)
    mk = params["spatial_mix_k"].reshape(1, 1, C)
    mv = params["spatial_mix_v"].reshape(1, 1, C)
    mr = params["spatial_mix_r"].reshape(1, 1, C)
    xk = x * mk + xx * (1 - mk)
    xv = x * mv + xx * (1 - mv)
    xr = x * mr + xx * (1 - mr)
    k = xk @ params["wk"]
    v = xv @ params["wv"]
    r = xr @ params["wr"]
    sr = jax.nn.sigmoid(r)

    w = (params["spatial_decay"] / T).reshape(C)
    u = (params["spatial_first"] / T).reshape(C)

    def wkv_one(kb, vb):
        def step(carry, kv_t):
            p, q, o = carry
            kt, vt = kv_t
            no = jnp.maximum(o, u + kt)
            A = jnp.exp(o - no)
            Bc = jnp.exp(u + kt - no)
            y = (A * p + Bc * vt) / (A * q + Bc)
            no2 = jnp.maximum(w + o, kt)
            A2 = jnp.exp(w + o - no2)
            B2 = jnp.exp(kt - no2)
            return (A2 * p + B2 * vt, A2 * q + B2, no2), y
        init = (jnp.zeros(C), jnp.zeros(C), jnp.full((C,), MIN_VALUE))
        _, ys = jax.lax.scan(step, init, (kb, vb))
        return ys

    rwkv = jax.vmap(wkv_one)(k, v)
    rwkv = sr * rwkv        # key_norm is None in this configuration
    return rwkv @ params["wo"]


if __name__ == "__main__":
    # Small shapes that still exercise batch padding (24 -> 32), time padding
    # (20 -> 24), a >=2-length "parallel" batch axis (nb = 2), and multiple
    # time chunks with carried state (3 chunks of 8 steps).
    B, T, C = 24, 20, 128
    n_layer, layer_id = 4, 1

    key = jax.random.PRNGKey(0)
    kx, kp = jax.random.split(key)
    x = jax.random.normal(kx, (B, T, C), jnp.float32)
    params = make_params(C, n_layer, layer_id, kp)

    out = jax.block_until_ready(temrwkv_signalmix(x, params, tc_target=8))
    ref = jax.block_until_ready(reference_forward(x, params))

    if not np.allclose(np.asarray(out), np.asarray(ref), rtol=1e-4, atol=1e-4):
        err = float(np.max(np.abs(np.asarray(out) - np.asarray(ref))))
        raise AssertionError(f"Pallas kernel does not match reference (max abs err {err})")

    print("KERNEL_OK")
</pallas_src>

<mosaic_0001>
module attributes {stable_mosaic.version = 11 : i64} {
  func.func @_temrwkv_kernel(%arg0: i32, %arg1: i32, %arg2: memref<8x16x128xf32, #tpu.memory_space<vmem>>, %arg3: memref<128x768xf32, #tpu.memory_space<vmem>>, %arg4: memref<128x128xf32, #tpu.memory_space<vmem>>, %arg5: memref<1x128xf32, #tpu.memory_space<vmem>>, %arg6: memref<1x128xf32, #tpu.memory_space<vmem>>, %arg7: memref<8x16x128xf32, #tpu.memory_space<vmem>>, %arg8: memref<128x128xf32, #tpu.memory_space<vmem>>, %arg9: memref<128x128xf32, #tpu.memory_space<vmem>>, %arg10: memref<128x128xf32, #tpu.memory_space<vmem>>, %arg11: memref<16x384xf32, #tpu.memory_space<vmem>>, %arg12: memref<16x128xf32, #tpu.memory_space<vmem>>, %arg13: memref<16x128xf32, #tpu.memory_space<vmem>>, %arg14: memref<16x128xf32, #tpu.memory_space<vmem>>) attributes {dimension_semantics = [#tpu.dimension_semantics<parallel>, #tpu.dimension_semantics<arbitrary>], iteration_bounds = array<i64: 2, 3>, scalar_prefetch = 0 : i64, scratch_operands = 7 : i64, tpu.core_type = #tpu.core_type<tc>, window_params = [{transform_indices = @transform_0, window_bounds = array<i64: 8, 16, 128>}, {pipeline_mode = #tpu.pipeline_mode<synchronous>, transform_indices = @transform_1, window_bounds = array<i64: 128, 768>}, {pipeline_mode = #tpu.pipeline_mode<synchronous>, transform_indices = @transform_2, window_bounds = array<i64: 128, 128>}, {pipeline_mode = #tpu.pipeline_mode<synchronous>, transform_indices = @transform_3, window_bounds = array<i64: 1, 128>}, {pipeline_mode = #tpu.pipeline_mode<synchronous>, transform_indices = @transform_4, window_bounds = array<i64: 1, 128>}, {transform_indices = @transform_5, window_bounds = array<i64: 8, 16, 128>}]} {
    %c0_i32 = arith.constant 0 : i32
    %0 = arith.cmpi eq, %arg1, %c0_i32 : i32
    %1 = arith.extui %0 : i1 to i32
    %c0_i32_0 = arith.constant 0 : i32
    %2 = arith.cmpi ne, %1, %c0_i32_0 : i32
    scf.if %2 {
      %cst_84 = arith.constant 0.000000e+00 : f32
      %362 = vector.broadcast %cst_84 : f32 to vector<16x128xf32>
      %c0_85 = arith.constant 0 : index
      %c0_86 = arith.constant 0 : index
      %363 = vector.load %arg12[%c0_85, %c0_86] : memref<16x128xf32, #tpu.memory_space<vmem>>, vector<16x128xf32>
      tpu.vector_store %arg12[%c0_85, %c0_86], %362 {strides = array<i32>} : memref<16x128xf32, #tpu.memory_space<vmem>>, vector<16x128xf32>,
      %cst_87 = arith.constant 0.000000e+00 : f32
      %364 = vector.broadcast %cst_87 : f32 to vector<16x128xf32>
      %c0_88 = arith.constant 0 : index
      %c0_89 = arith.constant 0 : index
      %365 = vector.load %arg13[%c0_88, %c0_89] : memref<16x128xf32, #tpu.memory_space<vmem>>, vector<16x128xf32>
      tpu.vector_store %arg13[%c0_88, %c0_89], %364 {strides = array<i32>} : memref<16x128xf32, #tpu.memory_space<vmem>>, vector<16x128xf32>,
      %cst_90 = arith.constant -9.99999968E+37 : f32
      %366 = vector.broadcast %cst_90 : f32 to vector<16x128xf32>
      %c0_91 = arith.constant 0 : index
      %c0_92 = arith.constant 0 : index
      %367 = vector.load %arg14[%c0_91, %c0_92] : memref<16x128xf32, #tpu.memory_space<vmem>>, vector<16x128xf32>
      tpu.vector_store %arg14[%c0_91, %c0_92], %366 {strides = array<i32>} : memref<16x128xf32, #tpu.memory_space<vmem>>, vector<16x128xf32>,
      %cst_93 = arith.constant 0.000000e+00 : f32
      %368 = vector.broadcast %cst_93 : f32 to vector<16x384xf32>
      %c0_94 = arith.constant 0 : index
      %c0_95 = arith.constant 0 : index
      %369 = vector.load %arg11[%c0_94, %c0_95] : memref<16x384xf32, #tpu.memory_space<vmem>>, vector<16x384xf32>
      tpu.vector_store %arg11[%c0_94, %c0_95], %368 {strides = array<i32>} : memref<16x384xf32, #tpu.memory_space<vmem>>, vector<16x384xf32>,
    } else {
    }
    %c0 = arith.constant 0 : index
    %c0_1 = arith.constant 0 : index
    %c0_2 = arith.constant 0 : index
    %3 = vector.load %arg2[%c0, %c0_1, %c0_2] : memref<8x16x128xf32, #tpu.memory_space<vmem>>, vector<8x16x128xf32>
    %4 = vector.shape_cast %3 : vector<8x16x128xf32> to vector<128x128xf32>
    %c0_3 = arith.constant 0 : index
    %c0_4 = arith.constant 0 : index
    %5 = vector.load %arg3[%c0_3, %c0_4] : memref<128x768xf32, #tpu.memory_space<vmem>>, vector<128x768xf32>
    %cst = arith.constant dense<0.000000e+00> : vector<128x768xf32>
    %6 = tpu.matmul %4, %5, %cst {dimension_numbers = #tpu.dot_dimension_numbers<[1], [0], [0], [1], [0, 0, 1, 1], [], []>} : vector<128x128xf32>, vector<128x768xf32>, vector<128x768xf32> -> vector<128x768xf32>
    %7 = vector.extract_strided_slice %6 {offsets = [0, 0], sizes = [128, 384], strides = [1, 1]} : vector<128x768xf32> to vector<128x384xf32>
    %8 = vector.extract_strided_slice %6 {offsets = [0, 384], sizes = [128, 384], strides = [1, 1]} : vector<128x768xf32> to vector<128x384xf32>
    %c16_i32 = arith.constant 16 : i32
    %9 = tpu.dynamic_rotate %8 by %c16_i32 dim 0 : vector<128x384xf32>, i32 -> vector<128x384xf32>
    %10 = arith.addf %7, %9 : vector<128x384xf32>
    %11 = vector.extract_strided_slice %10 {offsets = [0, 0], sizes = [128, 128], strides = [1, 1]} : vector<128x384xf32> to vector<128x128xf32>
    %c0_5 = arith.constant 0 : index
    %c0_6 = arith.constant 0 : index
    %12 = vector.load %arg8[%c0_5, %c0_6] : memref<128x128xf32, #tpu.memory_space<vmem>>, vector<128x128xf32>
    tpu.vector_store %arg8[%c0_5, %c0_6], %11 {strides = array<i32>} : memref<128x128xf32, #tpu.memory_space<vmem>>, vector<128x128xf32>,
    %13 = vector.extract_strided_slice %10 {offsets = [0, 128], sizes = [128, 128], strides = [1, 1]} : vector<128x384xf32> to vector<128x128xf32>
    %c0_7 = arith.constant 0 : index
    %c0_8 = arith.constant 0 : index
    %14 = vector.load %arg9[%c0_7, %c0_8] : memref<128x128xf32, #tpu.memory_space<vmem>>, vector<128x128xf32>
    tpu.vector_store %arg9[%c0_7, %c0_8], %13 {strides = array<i32>} : memref<128x128xf32, #tpu.memory_space<vmem>>, vector<128x128xf32>,
    %15 = vector.extract_strided_slice %10 {offsets = [0, 256], sizes = [128, 128], strides = [1, 1]} : vector<128x384xf32> to vector<128x128xf32>
    %16 = arith.negf %15 : vector<128x128xf32>
    %17 = math.exp %16 : vector<128x128xf32>
    %cst_9 = arith.constant 1.000000e+00 : f32
    %18 = vector.broadcast %cst_9 : f32 to vector<128x128xf32>
    %19 = arith.addf %18, %17 : vector<128x128xf32>
    %20 = arith.divf %18, %19 : vector<128x128xf32>
    %c0_10 = arith.constant 0 : index
    %c0_11 = arith.constant 0 : index
    %21 = vector.load %arg10[%c0_10, %c0_11] : memref<128x128xf32, #tpu.memory_space<vmem>>, vector<128x128xf32>
    tpu.vector_store %arg10[%c0_10, %c0_11], %20 {strides = array<i32>} : memref<128x128xf32, #tpu.memory_space<vmem>>, vector<128x128xf32>,
    %22 = vector.extract_strided_slice %7 {offsets = [0, 0], sizes = [16, 384], strides = [1, 1]} : vector<128x384xf32> to vector<16x384xf32>
    %c0_12 = arith.constant 0 : index
    %c0_13 = arith.constant 0 : index
    %23 = vector.load %arg11[%c0_12, %c0_13] : memref<16x384xf32, #tpu.memory_space<vmem>>, vector<16x384xf32>
    %24 = arith.addf %22, %23 : vector<16x384xf32>
    %25 = vector.extract_strided_slice %24 {offsets = [0, 0], sizes = [16, 128], strides = [1, 1]} : vector<16x384xf32> to vector<16x128xf32>
    %c0_14 = arith.constant 0 : index
    %c0_15 = arith.constant 0 : index
    %26 = vector.load %arg8[%c0_14, %c0_15] : memref<128x128xf32, #tpu.memory_space<vmem>>, vector<16x128xf32>
    tpu.vector_store %arg8[%c0_14, %c0_15], %25 {strides = array<i32>} : memref<128x128xf32, #tpu.memory_space<vmem>>, vector<16x128xf32>,
    %27 = vector.extract_strided_slice %24 {offsets = [0, 128], sizes = [16, 128], strides = [1, 1]} : vector<16x384xf32> to vector<16x128xf32>
    %c0_16 = arith.constant 0 : index
    %c0_17 = arith.constant 0 : index
    %28 = vector.load %arg9[%c0_16, %c0_17] : memref<128x128xf32, #tpu.memory_space<vmem>>, vector<16x128xf32>
    tpu.vector_store %arg9[%c0_16, %c0_17], %27 {strides = array<i32>} : memref<128x128xf32, #tpu.memory_space<vmem>>, vector<16x128xf32>,
    %29 = vector.extract_strided_slice %24 {offsets = [0, 256], sizes = [16, 128], strides = [1, 1]} : vector<16x384xf32> to vector<16x128xf32>
    %30 = arith.negf %29 : vector<16x128xf32>
    %31 = math.exp %30 : vector<16x128xf32>
    %cst_18 = arith.constant 1.000000e+00 : f32
    %32 = vector.broadcast %cst_18 : f32 to vector<16x128xf32>
    %33 = arith.addf %32, %31 : vector<16x128xf32>
    %34 = arith.divf %32, %33 : vector<16x128xf32>
    %c0_19 = arith.constant 0 : index
    %c0_20 = arith.constant 0 : index
    %35 = vector.load %arg10[%c0_19, %c0_20] : memref<128x128xf32, #tpu.memory_space<vmem>>, vector<16x128xf32>
    tpu.vector_store %arg10[%c0_19, %c0_20], %34 {strides = array<i32>} : memref<128x128xf32, #tpu.memory_space<vmem>>, vector<16x128xf32>,
    %36 = vector.extract_strided_slice %8 {offsets = [112, 0], sizes = [16, 384], strides = [1, 1]} : vector<128x384xf32> to vector<16x384xf32>
    %c0_21 = arith.constant 0 : index
    %c0_22 = arith.constant 0 : index
    %37 = vector.load %arg11[%c0_21, %c0_22] : memref<16x384xf32, #tpu.memory_space<vmem>>, vector<16x384xf32>
    tpu.vector_store %arg11[%c0_21, %c0_22], %36 {strides = array<i32>} : memref<16x384xf32, #tpu.memory_space<vmem>>, vector<16x384xf32>,
    %c0_23 = arith.constant 0 : index
    %c0_24 = arith.constant 0 : index
    %38 = vector.load %arg5[%c0_23, %c0_24] : memref<1x128xf32, #tpu.memory_space<vmem>>, vector<1x128xf32>
    %39 = vector.shape_cast %38 : vector<1x128xf32> to vector<1x128xf32>
    %40 = vector.broadcast %39 : vector<1x128xf32> to vector<16x128xf32>
    %c0_25 = arith.constant 0 : index
    %c0_26 = arith.constant 0 : index
    %41 = vector.load %arg6[%c0_25, %c0_26] : memref<1x128xf32, #tpu.memory_space<vmem>>, vector<1x128xf32>
    %42 = vector.shape_cast %41 : vector<1x128xf32> to vector<1x128xf32>
    %43 = vector.broadcast %42 : vector<1x128xf32> to vector<16x128xf32>
    %c0_27 = arith.constant 0 : index
    %c0_28 = arith.constant 0 : index
    %44 = vector.load %arg12[%c0_27, %c0_28] : memref<16x128xf32, #tpu.memory_space<vmem>>, vector<16x128xf32>
    %c0_29 = arith.constant 0 : index
    %c0_30 = arith.constant 0 : index
    %45 = vector.load %arg13[%c0_29, %c0_30] : memref<16x128xf32, #tpu.memory_space<vmem>>, vector<16x128xf32>
    %c0_31 = arith.constant 0 : index
    %c0_32 = arith.constant 0 : index
    %46 = vector.load %arg14[%c0_31, %c0_32] : memref<16x128xf32, #tpu.memory_space<vmem>>, vector<16x128xf32>
    %c0_i32_33 = arith.constant 0 : i32
    %c128_i32 = arith.constant 128 : i32
    %47 = arith.muli %c0_i32_33, %c128_i32 : i32
    %c0_i32_34 = arith.constant 0 : i32
    %48 = arith.addi %47, %c0_i32_34 : i32
    %49 = tpu.assume_multiple %48, 16 : i32
    %50 = arith.index_cast %49 : i32 to index
    %c0_35 = arith.constant 0 : index
    %51 = vector.load %arg8[%50, %c0_35] : memref<128x128xf32, #tpu.memory_space<vmem>>, vector<16x128xf32>
    %52 = arith.index_cast %49 : i32 to index
    %c0_36 = arith.constant 0 : index
    %53 = vector.load %arg9[%52, %c0_36] : memref<128x128xf32, #tpu.memory_space<vmem>>, vector<16x128xf32>
    %54 = arith.addf %43, %51 : vector<16x128xf32>
    %55 = arith.maximumf %46, %54 : vector<16x128xf32>
    %56 = arith.subf %46, %55 : vector<16x128xf32>
    %57 = math.exp %56 : vector<16x128xf32>
    %58 = arith.addf %43, %51 : vector<16x128xf32>
    %59 = arith.subf %58, %55 : vector<16x128xf32>
    %60 = math.exp %59 : vector<16x128xf32>
    %61 = arith.mulf %57, %44 : vector<16x128xf32>
    %62 = arith.mulf %60, %53 : vector<16x128xf32>
    %63 = arith.addf %61, %62 : vector<16x128xf32>
    %64 = arith.mulf %57, %45 : vector<16x128xf32>
    %65 = arith.addf %64, %60 : vector<16x128xf32>
    %66 = tpu.reciprocal %65 {approx = true} : vector<16x128xf32> -> vector<16x128xf32>
    %67 = arith.mulf %65, %66 : vector<16x128xf32>
    %cst_37 = arith.constant 2.000000e+00 : f32
    %68 = vector.broadcast %cst_37 : f32 to vector<16x128xf32>
    %69 = arith.subf %68, %67 : vector<16x128xf32>
    %70 = arith.mulf %66, %69 : vector<16x128xf32>
    %71 = arith.mulf %63, %70 : vector<16x128xf32>
    %72 = arith.index_cast %49 : i32 to index
    %c0_38 = arith.constant 0 : index
    %73 = vector.load %arg8[%72, %c0_38] : memref<128x128xf32, #tpu.memory_space<vmem>>, vector<16x128xf32>
    tpu.vector_store %arg8[%72, %c0_38], %71 {strides = array<i32>} : memref<128x128xf32, #tpu.memory_space<vmem>>, vector<16x128xf32>,
    %74 = arith.addf %40, %46 : vector<16x128xf32>
    %75 = arith.maximumf %74, %51 : vector<16x128xf32>
    %76 = arith.addf %40, %46 : vector<16x128xf32>
    %77 = arith.subf %76, %75 : vector<16x128xf32>
    %78 = math.exp %77 : vector<16x128xf32>
    %79 = arith.subf %51, %75 : vector<16x128xf32>
    %80 = math.exp %79 : vector<16x128xf32>
    %81 = arith.mulf %78, %44 : vector<16x128xf32>
    %82 = arith.mulf %80, %53 : vector<16x128xf32>
    %83 = arith.addf %81, %82 : vector<16x128xf32>
    %84 = arith.mulf %78, %45 : vector<16x128xf32>
    %85 = arith.addf %84, %80 : vector<16x128xf32>
    %c16_i32_39 = arith.constant 16 : i32
    %86 = arith.addi %47, %c16_i32_39 : i32
    %87 = tpu.assume_multiple %86, 16 : i32
    %88 = arith.index_cast %87 : i32 to index
    %c0_40 = arith.constant 0 : index
    %89 = vector.load %arg8[%88, %c0_40] : memref<128x128xf32, #tpu.memory_space<vmem>>, vector<16x128xf32>
    %90 = arith.index_cast %87 : i32 to index
    %c0_41 = arith.constant 0 : index
    %91 = vector.load %arg9[%90, %c0_41] : memref<128x128xf32, #tpu.memory_space<vmem>>, vector<16x128xf32>
    %92 = arith.addf %43, %89 : vector<16x128xf32>
    %93 = arith.maximumf %75, %92 : vector<16x128xf32>
    %94 = arith.subf %75, %93 : vector<16x128xf32>
    %95 = math.exp %94 : vector<16x128xf32>
    %96 = arith.addf %43, %89 : vector<16x128xf32>
    %97 = arith.subf %96, %93 : vector<16x128xf32>
    %98 = math.exp %97 : vector<16x128xf32>
    %99 = arith.mulf %95, %83 : vector<16x128xf32>
    %100 = arith.mulf %98, %91 : vector<16x128xf32>
    %101 = arith.addf %99, %100 : vector<16x128xf32>
    %102 = arith.mulf %95, %85 : vector<16x128xf32>
    %103 = arith.addf %102, %98 : vector<16x128xf32>
    %104 = tpu.reciprocal %103 {approx = true} : vector<16x128xf32> -> vector<16x128xf32>
    %105 = arith.mulf %103, %104 : vector<16x128xf32>
    %cst_42 = arith.constant 2.000000e+00 : f32
    %106 = vector.broadcast %cst_42 : f32 to vector<16x128xf32>
    %107 = arith.subf %106, %105 : vector<16x128xf32>
    %108 = arith.mulf %104, %107 : vector<16x128xf32>
    %109 = arith.mulf %101, %108 : vector<16x128xf32>
    %110 = arith.index_cast %87 : i32 to index
    %c0_43 = arith.constant 0 : index
    %111 = vector.load %arg8[%110, %c0_43] : memref<128x128xf32, #tpu.memory_space<vmem>>, vector<16x128xf32>
    tpu.vector_store %arg8[%110, %c0_43], %109 {strides = array<i32>} : memref<128x128xf32, #tpu.memory_space<vmem>>, vector<16x128xf32>,
    %112 = arith.addf %40, %75 : vector<16x128xf32>
    %113 = arith.maximumf %112, %89 : vector<16x128xf32>
    %114 = arith.addf %40, %75 : vector<16x128xf32>
    %115 = arith.subf %114, %113 : vector<16x128xf32>
    %116 = math.exp %115 : vector<16x128xf32>
    %117 = arith.subf %89, %113 : vector<16x128xf32>
    %118 = math.exp %117 : vector<16x128xf32>
    %119 = arith.mulf %116, %83 : vector<16x128xf32>
    %120 = arith.mulf %118, %91 : vector<16x128xf32>
    %121 = arith.addf %119, %120 : vector<16x128xf32>
    %122 = arith.mulf %116, %85 : vector<16x128xf32>
    %123 = arith.addf %122, %118 : vector<16x128xf32>
    %c32_i32 = arith.constant 32 : i32
    %124 = arith.addi %47, %c32_i32 : i32
    %125 = tpu.assume_multiple %124, 16 : i32
    %126 = arith.index_cast %125 : i32 to index
    %c0_44 = arith.constant 0 : index
    %127 = vector.load %arg8[%126, %c0_44] : memref<128x128xf32, #tpu.memory_space<vmem>>, vector<16x128xf32>
    %128 = arith.index_cast %125 : i32 to index
    %c0_45 = arith.constant 0 : index
    %129 = vector.load %arg9[%128, %c0_45] : memref<128x128xf32, #tpu.memory_space<vmem>>, vector<16x128xf32>
    %130 = arith.addf %43, %127 : vector<16x128xf32>
    %131 = arith.maximumf %113, %130 : vector<16x128xf32>
    %132 = arith.subf %113, %131 : vector<16x128xf32>
    %133 = math.exp %132 : vector<16x128xf32>
    %134 = arith.addf %43, %127 : vector<16x128xf32>
    %135 = arith.subf %134, %131 : vector<16x128xf32>
    %136 = math.exp %135 : vector<16x128xf32>
    %137 = arith.mulf %133, %121 : vector<16x128xf32>
    %138 = arith.mulf %136, %129 : vector<16x128xf32>
    %139 = arith.addf %137, %138 : vector<16x128xf32>
    %140 = arith.mulf %133, %123 : vector<16x128xf32>
    %141 = arith.addf %140, %136 : vector<16x128xf32>
    %142 = tpu.reciprocal %141 {approx = true} : vector<16x128xf32> -> vector<16x128xf32>
    %143 = arith.mulf %141, %142 : vector<16x128xf32>
    %cst_46 = arith.constant 2.000000e+00 : f32
    %144 = vector.broadcast %cst_46 : f32 to vector<16x128xf32>
    %145 = arith.subf %144, %143 : vector<16x128xf32>
    %146 = arith.mulf %142, %145 : vector<16x128xf32>
    %147 = arith.mulf %139, %146 : vector<16x128xf32>
    %148 = arith.index_cast %125 : i32 to index
    %c0_47 = arith.constant 0 : index
    %149 = vector.load %arg8[%148, %c0_47] : memref<128x128xf32, #tpu.memory_space<vmem>>, vector<16x128xf32>
    tpu.vector_store %arg8[%148, %c0_47], %147 {strides = array<i32>} : memref<128x128xf32, #tpu.memory_space<vmem>>, vector<16x128xf32>,
    %150 = arith.addf %40, %113 : vector<16x128xf32>
    %151 = arith.maximumf %150, %127 : vector<16x128xf32>
    %152 = arith.addf %40, %113 : vector<16x128xf32>
    %153 = arith.subf %152, %151 : vector<16x128xf32>
    %154 = math.exp %153 : vector<16x128xf32>
    %155 = arith.subf %127, %151 : vector<16x128xf32>
    %156 = math.exp %155 : vector<16x128xf32>
    %157 = arith.mulf %154, %121 : vector<16x128xf32>
    %158 = arith.mulf %156, %129 : vector<16x128xf32>
    %159 = arith.addf %157, %158 : vector<16x128xf32>
    %160 = arith.mulf %154, %123 : vector<16x128xf32>
    %161 = arith.addf %160, %156 : vector<16x128xf32>
    %c48_i32 = arith.constant 48 : i32
    %162 = arith.addi %47, %c48_i32 : i32
    %163 = tpu.assume_multiple %162, 16 : i32
    %164 = arith.index_cast %163 : i32 to index
    %c0_48 = arith.constant 0 : index
    %165 = vector.load %arg8[%164, %c0_48] : memref<128x128xf32, #tpu.memory_space<vmem>>, vector<16x128xf32>
    %166 = arith.index_cast %163 : i32 to index
    %c0_49 = arith.constant 0 : index
    %167 = vector.load %arg9[%166, %c0_49] : memref<128x128xf32, #tpu.memory_space<vmem>>, vector<16x128xf32>
    %168 = arith.addf %43, %165 : vector<16x128xf32>
    %169 = arith.maximumf %151, %168 : vector<16x128xf32>
    %170 = arith.subf %151, %169 : vector<16x128xf32>
    %171 = math.exp %170 : vector<16x128xf32>
    %172 = arith.addf %43, %165 : vector<16x128xf32>
    %173 = arith.subf %172, %169 : vector<16x128xf32>
    %174 = math.exp %173 : vector<16x128xf32>
    %175 = arith.mulf %171, %159 : vector<16x128xf32>
    %176 = arith.mulf %174, %167 : vector<16x128xf32>
    %177 = arith.addf %175, %176 : vector<16x128xf32>
    %178 = arith.mulf %171, %161 : vector<16x128xf32>
    %179 = arith.addf %178, %174 : vector<16x128xf32>
    %180 = tpu.reciprocal %179 {approx = true} : vector<16x128xf32> -> vector<16x128xf32>
    %181 = arith.mulf %179, %180 : vector<16x128xf32>
    %cst_50 = arith.constant 2.000000e+00 : f32
    %182 = vector.broadcast %cst_50 : f32 to vector<16x128xf32>
    %183 = arith.subf %182, %181 : vector<16x128xf32>
    %184 = arith.mulf %180, %183 : vector<16x128xf32>
    %185 = arith.mulf %177, %184 : vector<16x128xf32>
    %186 = arith.index_cast %163 : i32 to index
    %c0_51 = arith.constant 0 : index
    %187 = vector.load %arg8[%186, %c0_51] : memref<128x128xf32, #tpu.memory_space<vmem>>, vector<16x128xf32>
    tpu.vector_store %arg8[%186, %c0_51], %185 {strides = array<i32>} : memref<128x128xf32, #tpu.memory_space<vmem>>, vector<16x128xf32>,
    %188 = arith.addf %40, %151 : vector<16x128xf32>
    %189 = arith.maximumf %188, %165 : vector<16x128xf32>
    %190 = arith.addf %40, %151 : vector<16x128xf32>
    %191 = arith.subf %190, %189 : vector<16x128xf32>
    %192 = math.exp %191 : vector<16x128xf32>
    %193 = arith.subf %165, %189 : vector<16x128xf32>
    %194 = math.exp %193 : vector<16x128xf32>
    %195 = arith.mulf %192, %159 : vector<16x128xf32>
    %196 = arith.mulf %194, %167 : vector<16x128xf32>
    %197 = arith.addf %195, %196 : vector<16x128xf32>
    %198 = arith.mulf %192, %161 : vector<16x128xf32>
    %199 = arith.addf %198, %194 : vector<16x128xf32>
    %c64_i32 = arith.constant 64 : i32
    %200 = arith.addi %47, %c64_i32 : i32
    %201 = tpu.assume_multiple %200, 16 : i32
    %202 = arith.index_cast %201 : i32 to index
    %c0_52 = arith.constant 0 : index
    %203 = vector.load %arg8[%202, %c0_52] : memref<128x128xf32, #tpu.memory_space<vmem>>, vector<16x128xf32>
    %204 = arith.index_cast %201 : i32 to index
    %c0_53 = arith.constant 0 : index
    %205 = vector.load %arg9[%204, %c0_53] : memref<128x128xf32, #tpu.memory_space<vmem>>, vector<16x128xf32>
    %206 = arith.addf %43, %203 : vector<16x128xf32>
    %207 = arith.maximumf %189, %206 : vector<16x128xf32>
    %208 = arith.subf %189, %207 : vector<16x128xf32>
    %209 = math.exp %208 : vector<16x128xf32>
    %210 = arith.addf %43, %203 : vector<16x128xf32>
    %211 = arith.subf %210, %207 : vector<16x128xf32>
    %212 = math.exp %211 : vector<16x128xf32>
    %213 = arith.mulf %209, %197 : vector<16x128xf32>
    %214 = arith.mulf %212, %205 : vector<16x128xf32>
    %215 = arith.addf %213, %214 : vector<16x128xf32>
    %216 = arith.mulf %209, %199 : vector<16x128xf32>
    %217 = arith.addf %216, %212 : vector<16x128xf32>
    %218 = tpu.reciprocal %217 {approx = true} : vector<16x128xf32> -> vector<16x128xf32>
    %219 = arith.mulf %217, %218 : vector<16x128xf32>
    %cst_54 = arith.constant 2.000000e+00 : f32
    %220 = vector.broadcast %cst_54 : f32 to vector<16x128xf32>
    %221 = arith.subf %220, %219 : vector<16x128xf32>
    %222 = arith.mulf %218, %221 : vector<16x128xf32>
    %223 = arith.mulf %215, %222 : vector<16x128xf32>
    %224 = arith.index_cast %201 : i32 to index
    %c0_55 = arith.constant 0 : index
    %225 = vector.load %arg8[%224, %c0_55] : memref<128x128xf32, #tpu.memory_space<vmem>>, vector<16x128xf32>
    tpu.vector_store %arg8[%224, %c0_55], %223 {strides = array<i32>} : memref<128x128xf32, #tpu.memory_space<vmem>>, vector<16x128xf32>,
    %226 = arith.addf %40, %189 : vector<16x128xf32>
    %227 = arith.maximumf %226, %203 : vector<16x128xf32>
    %228 = arith.addf %40, %189 : vector<16x128xf32>
    %229 = arith.subf %228, %227 : vector<16x128xf32>
    %230 = math.exp %229 : vector<16x128xf32>
    %231 = arith.subf %203, %227 : vector<16x128xf32>
    %232 = math.exp %231 : vector<16x128xf32>
    %233 = arith.mulf %230, %197 : vector<16x128xf32>
    %234 = arith.mulf %232, %205 : vector<16x128xf32>
    %235 = arith.addf %233, %234 : vector<16x128xf32>
    %236 = arith.mulf %230, %199 : vector<16x128xf32>
    %237 = arith.addf %236, %232 : vector<16x128xf32>
    %c80_i32 = arith.constant 80 : i32
    %238 = arith.addi %47, %c80_i32 : i32
    %239 = tpu.assume_multiple %238, 16 : i32
    %240 = arith.index_cast %239 : i32 to index
    %c0_56 = arith.constant 0 : index
    %241 = vector.load %arg8[%240, %c0_56] : memref<128x128xf32, #tpu.memory_space<vmem>>, vector<16x128xf32>
    %242 = arith.index_cast %239 : i32 to index
    %c0_57 = arith.constant 0 : index
    %243 = vector.load %arg9[%242, %c0_57] : memref<128x128xf32, #tpu.memory_space<vmem>>, vector<16x128xf32>
    %244 = arith.addf %43, %241 : vector<16x128xf32>
    %245 = arith.maximumf %227, %244 : vector<16x128xf32>
    %246 = arith.subf %227, %245 : vector<16x128xf32>
    %247 = math.exp %246 : vector<16x128xf32>
    %248 = arith.addf %43, %241 : vector<16x128xf32>
    %249 = arith.subf %248, %245 : vector<16x128xf32>
    %250 = math.exp %249 : vector<16x128xf32>
    %251 = arith.mulf %247, %235 : vector<16x128xf32>
    %252 = arith.mulf %250, %243 : vector<16x128xf32>
    %253 = arith.addf %251, %252 : vector<16x128xf32>
    %254 = arith.mulf %247, %237 : vector<16x128xf32>
    %255 = arith.addf %254, %250 : vector<16x128xf32>
    %256 = tpu.reciprocal %255 {approx = true} : vector<16x128xf32> -> vector<16x128xf32>
    %257 = arith.mulf %255, %256 : vector<16x128xf32>
    %cst_58 = arith.constant 2.000000e+00 : f32
    %258 = vector.broadcast %cst_58 : f32 to vector<16x128xf32>
    %259 = arith.subf %258, %257 : vector<16x128xf32>
    %260 = arith.mulf %256, %259 : vector<16x128xf32>
    %261 = arith.mulf %253, %260 : vector<16x128xf32>
    %262 = arith.index_cast %239 : i32 to index
    %c0_59 = arith.constant 0 : index
    %263 = vector.load %arg8[%262, %c0_59] : memref<128x128xf32, #tpu.memory_space<vmem>>, vector<16x128xf32>
    tpu.vector_store %arg8[%262, %c0_59], %261 {strides = array<i32>} : memref<128x128xf32, #tpu.memory_space<vmem>>, vector<16x128xf32>,
    %264 = arith.addf %40, %227 : vector<16x128xf32>
    %265 = arith.maximumf %264, %241 : vector<16x128xf32>
    %266 = arith.addf %40, %227 : vector<16x128xf32>
    %267 = arith.subf %266, %265 : vector<16x128xf32>
    %268 = math.exp %267 : vector<16x128xf32>
    %269 = arith.subf %241, %265 : vector<16x128xf32>
    %270 = math.exp %269 : vector<16x128xf32>
    %271 = arith.mulf %268, %235 : vector<16x128xf32>
    %272 = arith.mulf %270, %243 : vector<16x128xf32>
    %273 = arith.addf %271, %272 : vector<16x128xf32>
    %274 = arith.mulf %268, %237 : vector<16x128xf32>
    %275 = arith.addf %274, %270 : vector<16x128xf32>
    %c96_i32 = arith.constant 96 : i32
    %276 = arith.addi %47, %c96_i32 : i32
    %277 = tpu.assume_multiple %276, 16 : i32
    %278 = arith.index_cast %277 : i32 to index
    %c0_60 = arith.constant 0 : index
    %279 = vector.load %arg8[%278, %c0_60] : memref<128x128xf32, #tpu.memory_space<vmem>>, vector<16x128xf32>
    %280 = arith.index_cast %277 : i32 to index
    %c0_61 = arith.constant 0 : index
    %281 = vector.load %arg9[%280, %c0_61] : memref<128x128xf32, #tpu.memory_space<vmem>>, vector<16x128xf32>
    %282 = arith.addf %43, %279 : vector<16x128xf32>
    %283 = arith.maximumf %265, %282 : vector<16x128xf32>
    %284 = arith.subf %265, %283 : vector<16x128xf32>
    %285 = math.exp %284 : vector<16x128xf32>
    %286 = arith.addf %43, %279 : vector<16x128xf32>
    %287 = arith.subf %286, %283 : vector<16x128xf32>
    %288 = math.exp %287 : vector<16x128xf32>
    %289 = arith.mulf %285, %273 : vector<16x128xf32>
    %290 = arith.mulf %288, %281 : vector<16x128xf32>
    %291 = arith.addf %289, %290 : vector<16x128xf32>
    %292 = arith.mulf %285, %275 : vector<16x128xf32>
    %293 = arith.addf %292, %288 : vector<16x128xf32>
    %294 = tpu.reciprocal %293 {approx = true} : vector<16x128xf32> -> vector<16x128xf32>
    %295 = arith.mulf %293, %294 : vector<16x128xf32>
    %cst_62 = arith.constant 2.000000e+00 : f32
    %296 = vector.broadcast %cst_62 : f32 to vector<16x128xf32>
    %297 = arith.subf %296, %295 : vector<16x128xf32>
    %298 = arith.mulf %294, %297 : vector<16x128xf32>
    %299 = arith.mulf %291, %298 : vector<16x128xf32>
    %300 = arith.index_cast %277 : i32 to index
    %c0_63 = arith.constant 0 : index
    %301 = vector.load %arg8[%300, %c0_63] : memref<128x128xf32, #tpu.memory_space<vmem>>, vector<16x128xf32>
    tpu.vector_store %arg8[%300, %c0_63], %299 {strides = array<i32>} : memref<128x128xf32, #tpu.memory_space<vmem>>, vector<16x128xf32>,
    %302 = arith.addf %40, %265 : vector<16x128xf32>
    %303 = arith.maximumf %302, %279 : vector<16x128xf32>
    %304 = arith.addf %40, %265 : vector<16x128xf32>
    %305 = arith.subf %304, %303 : vector<16x128xf32>
    %306 = math.exp %305 : vector<16x128xf32>
    %307 = arith.subf %279, %303 : vector<16x128xf32>
    %308 = math.exp %307 : vector<16x128xf32>
    %309 = arith.mulf %306, %273 : vector<16x128xf32>
    %310 = arith.mulf %308, %281 : vector<16x128xf32>
    %311 = arith.addf %309, %310 : vector<16x128xf32>
    %312 = arith.mulf %306, %275 : vector<16x128xf32>
    %313 = arith.addf %312, %308 : vector<16x128xf32>
    %c112_i32 = arith.constant 112 : i32
    %314 = arith.addi %47, %c112_i32 : i32
    %315 = tpu.assume_multiple %314, 16 : i32
    %316 = arith.index_cast %315 : i32 to index
    %c0_64 = arith.constant 0 : index
    %317 = vector.load %arg8[%316, %c0_64] : memref<128x128xf32, #tpu.memory_space<vmem>>, vector<16x128xf32>
    %318 = arith.index_cast %315 : i32 to index
    %c0_65 = arith.constant 0 : index
    %319 = vector.load %arg9[%318, %c0_65] : memref<128x128xf32, #tpu.memory_space<vmem>>, vector<16x128xf32>
    %320 = arith.addf %43, %317 : vector<16x128xf32>
    %321 = arith.maximumf %303, %320 : vector<16x128xf32>
    %322 = arith.subf %303, %321 : vector<16x128xf32>
    %323 = math.exp %322 : vector<16x128xf32>
    %324 = arith.addf %43, %317 : vector<16x128xf32>
    %325 = arith.subf %324, %321 : vector<16x128xf32>
    %326 = math.exp %325 : vector<16x128xf32>
    %327 = arith.mulf %323, %311 : vector<16x128xf32>
    %328 = arith.mulf %326, %319 : vector<16x128xf32>
    %329 = arith.addf %327, %328 : vector<16x128xf32>
    %330 = arith.mulf %323, %313 : vector<16x128xf32>
    %331 = arith.addf %330, %326 : vector<16x128xf32>
    %332 = tpu.reciprocal %331 {approx = true} : vector<16x128xf32> -> vector<16x128xf32>
    %333 = arith.mulf %331, %332 : vector<16x128xf32>
    %cst_66 = arith.constant 2.000000e+00 : f32
    %334 = vector.broadcast %cst_66 : f32 to vector<16x128xf32>
    %335 = arith.subf %334, %333 : vector<16x128xf32>
    %336 = arith.mulf %332, %335 : vector<16x128xf32>
    %337 = arith.mulf %329, %336 : vector<16x128xf32>
    %338 = arith.index_cast %315 : i32 to index
    %c0_67 = arith.constant 0 : index
    %339 = vector.load %arg8[%338, %c0_67] : memref<128x128xf32, #tpu.memory_space<vmem>>, vector<16x128xf32>
    tpu.vector_store %arg8[%338, %c0_67], %337 {strides = array<i32>} : memref<128x128xf32, #tpu.memory_space<vmem>>, vector<16x128xf32>,
    %340 = arith.addf %40, %303 : vector<16x128xf32>
    %341 = arith.maximumf %340, %317 : vector<16x128xf32>
    %342 = arith.addf %40, %303 : vector<16x128xf32>
    %343 = arith.subf %342, %341 : vector<16x128xf32>
    %344 = math.exp %343 : vector<16x128xf32>
    %345 = arith.subf %317, %341 : vector<16x128xf32>
    %346 = math.exp %345 : vector<16x128xf32>
    %347 = arith.mulf %344, %311 : vector<16x128xf32>
    %348 = arith.mulf %346, %319 : vector<16x128xf32>
    %349 = arith.addf %347, %348 : vector<16x128xf32>
    %350 = arith.mulf %344, %313 : vector<16x128xf32>
    %351 = arith.addf %350, %346 : vector<16x128xf32>
    %c1_i32 = arith.constant 1 : i32
    %c0_68 = arith.constant 0 : index
    %c0_69 = arith.constant 0 : index
    %352 = vector.load %arg12[%c0_68, %c0_69] : memref<16x128xf32, #tpu.memory_space<vmem>>, vector<16x128xf32>
    tpu.vector_store %arg12[%c0_68, %c0_69], %349 {strides = array<i32>} : memref<16x128xf32, #tpu.memory_space<vmem>>, vector<16x128xf32>,
    %c0_70 = arith.constant 0 : index
    %c0_71 = arith.constant 0 : index
    %353 = vector.load %arg13[%c0_70, %c0_71] : memref<16x128xf32, #tpu.memory_space<vmem>>, vector<16x128xf32>
    tpu.vector_store %arg13[%c0_70, %c0_71], %351 {strides = array<i32>} : memref<16x128xf32, #tpu.memory_space<vmem>>, vector<16x128xf32>,
    %c0_72 = arith.constant 0 : index
    %c0_73 = arith.constant 0 : index
    %354 = vector.load %arg14[%c0_72, %c0_73] : memref<16x128xf32, #tpu.memory_space<vmem>>, vector<16x128xf32>
    tpu.vector_store %arg14[%c0_72, %c0_73], %341 {strides = array<i32>} : memref<16x128xf32, #tpu.memory_space<vmem>>, vector<16x128xf32>,
    %c0_74 = arith.constant 0 : index
    %c0_75 = arith.constant 0 : index
    %355 = vector.load %arg10[%c0_74, %c0_75] : memref<128x128xf32, #tpu.memory_space<vmem>>, vector<128x128xf32>
    %c0_76 = arith.constant 0 : index
    %c0_77 = arith.constant 0 : index
    %356 = vector.load %arg8[%c0_76, %c0_77] : memref<128x128xf32, #tpu.memory_space<vmem>>, vector<128x128xf32>
    %357 = arith.mulf %355, %356 : vector<128x128xf32>
    %c0_78 = arith.constant 0 : index
    %c0_79 = arith.constant 0 : index
    %358 = vector.load %arg4[%c0_78, %c0_79] : memref<128x128xf32, #tpu.memory_space<vmem>>, vector<128x128xf32>
    %cst_80 = arith.constant dense<0.000000e+00> : vector<128x128xf32>
    %359 = tpu.matmul %357, %358, %cst_80 {dimension_numbers = #tpu.dot_dimension_numbers<[1], [0], [0], [1], [0, 0, 1, 1], [], []>} : vector<128x128xf32>, vector<128x128xf32>, vector<128x128xf32> -> vector<128x128xf32>
    %360 = vector.shape_cast %359 : vector<128x128xf32> to vector<8x16x128xf32>
    %c0_81 = arith.constant 0 : index
    %c0_82 = arith.constant 0 : index
    %c0_83 = arith.constant 0 : index
    %361 = vector.load %arg7[%c0_81, %c0_82, %c0_83] : memref<8x16x128xf32, #tpu.memory_space<vmem>>, vector<8x16x128xf32>
    tpu.vector_store %arg7[%c0_81, %c0_82, %c0_83], %360 {strides = array<i32>} : memref<8x16x128xf32, #tpu.memory_space<vmem>>, vector<8x16x128xf32>,
    return
  }
  func.func @transform_0(%arg0: i32, %arg1: i32) -> (i32, i32, i32) {
    %c0_i32 = arith.constant 0 : i32
    %c0_i32_0 = arith.constant 0 : i32
    return %arg1, %arg0, %c0_i32 : i32, i32, i32
  }
  func.func @transform_1(%arg0: i32, %arg1: i32) -> (i32, i32) {
    %c0_i32 = arith.constant 0 : i32
    %c0_i32_0 = arith.constant 0 : i32
    %c0_i32_1 = arith.constant 0 : i32
    return %c0_i32, %c0_i32_0 : i32, i32
  }
  func.func @transform_2(%arg0: i32, %arg1: i32) -> (i32, i32) {
    %c0_i32 = arith.constant 0 : i32
    %c0_i32_0 = arith.constant 0 : i32
    %c0_i32_1 = arith.constant 0 : i32
    return %c0_i32, %c0_i32_0 : i32, i32
  }
  func.func @transform_3(%arg0: i32, %arg1: i32) -> (i32, i32) {
    %c0_i32 = arith.constant 0 : i32
    %c0_i32_0 = arith.constant 0 : i32
    %c0_i32_1 = arith.constant 0 : i32
    return %c0_i32, %c0_i32_0 : i32, i32
  }
  func.func @transform_4(%arg0: i32, %arg1: i32) -> (i32, i32) {
    %c0_i32 = arith.constant 0 : i32
    %c0_i32_0 = arith.constant 0 : i32
    %c0_i32_1 = arith.constant 0 : i32
    return %c0_i32, %c0_i32_0 : i32, i32
  }
  func.func @transform_5(%arg0: i32, %arg1: i32) -> (i32, i32, i32) {
    %c0_i32 = arith.constant 0 : i32
    %c0_i32_0 = arith.constant 0 : i32
    return %arg1, %arg0, %c0_i32 : i32, i32, i32
  }
}

</mosaic_0001>

<bundles_post_ra>
// kernel: tpu_custom_call.1
= control target key start
LH: loop header
LB: loop body
LE: loop exit
PB: predicated region body
PF: predicated region fallthrough
CT: control target
= control target key end

     0   :  { %s4061_s0 = inlined_call_operand.hbm [shape: f32[24,32,128], index: 0, kind: input, shape index: {}]   ;;  %s4062_s1 = inlined_call_operand.hbm [shape: f32[128,768], index: 1, kind: input, shape index: {}]   ;;  %s4063_s2 = inlined_call_operand.hbm [shape: f32[128,128], index: 2, kind: input, shape index: {}]   ;;  %s4064_s3 = inlined_call_operand.vmem [shape: f32[1,128], index: 3, kind: input, shape index: {}]   ;;  %s4065_s4 = inlined_call_operand.vmem [shape: f32[1,128], index: 4, kind: input, shape index: {}]   ;;  %s4066_s5 = inlined_call_operand.hbm [shape: f32[24,32,128], index: 5, kind: output, shape index: {}]  }
   0x1   :  { %4120 = sst [smem:[#allocation90_spill]] %s4066_s5 }
   0x2   :  { %10 = vsyncpa [#allocation10], 0 }
   0x3   :  { %12 = vsyncpa [#allocation10 + $0x1], 0 }
   0x4   :  { %13 = vsyncpa [#allocation13], 0 }
   0x5   :  { %14 = vsyncpa [#allocation11], 0 }
   0x6   :  { %16 = vsyncpa [#allocation11 + $0x1], 0  ;;  %s2922_s18 = smov 0   ;;  %s2924_s19 = smov 0  }
   0x7   :  { %s2926_s20 = smov 0   ;;  %s2928_s21 = smov 0  }
   0x8   :  { %s2930_s22 = smov 0   ;;  %s2932_s23 = smov 0  }
   0x9   :  { %s2934_s24 = smov 0   ;;  %s2936_s25 = smov 0  }
   0xa LB: > { %4121 = sst [smem:[#allocation24_spill]] %s2840_s18  ;;  %s2123_s26 = sadd.s32 4294967295, %s2868_s25   ;;  %s2868_s25 = sphi %s2936_s25, %s22_s25   ;;  %s2864_s24 = sphi %s2934_s24, %s4316_s24   ;;  %s2860_s23 = sphi %s2932_s23, %s4315_s23   ;;  %s2856_s22 = sphi %s2930_s22, %s4314_s22   ;;  %s2852_s21 = sphi %s2928_s21, %s4313_s21   ;;  %s2848_s20 = sphi %s2926_s20, %s4312_s20   ;;  %s2844_s19 = sphi %s2924_s19, %s4311_s19   ;;  %s2840_s18 = sphi %s2922_s18, %s4310_s18  }
   0xb   : > { %s2124_s27 = sadd.s32 4294967294, %s2868_s25   ;;  %s31_s28 = sadd.s32 1, %s2860_s23 }
   0xc   : > { %s34_s29 = sadd.s32 1, %s2864_s24  ;;  %p32_p0 = scmp.ge.s32.totalorder %s31_s28, 3 }
   0xd   : > { %s43_s30 = sadd.s32 1, %s2848_s20  ;;  %p50_p1 = scmp.ne.s32.totalorder %s2848_s20, %s2844_s19 }
   0xe   : > { %p51_p2 = scmp.eq.s32.totalorder %s2868_s25, 0  ;;  %s4318_s28 = smov (%p32_p0, %s31_s28), 0 }
   0xf   : > { %4122 = sst [smem:[#allocation25_spill]] %s4318_s28  ;;  %s4320_s29 = smov (!%p32_p0, %s34_s29), %s2864_s24 }
  0x10   : > { %s38_s6 = ssub.s32 %s2860_s23, %s4318_s28  ;;  %p2975_p3 = por %p51_p2, %p50_p1 }
  0x11   : > { %p36_p4 = scmp.ge.s32.totalorder %s4320_s29, 2  ;;  %p56_p5 = scmp.ne.s32.totalorder %s2844_s19, %s2840_s18 }
  0x12   : > { %s4123_s7 = scalar_select %p2975_p3, 1, 0 }
  0x13   : > { %p2981_p6 = scmp.eq.s32.totalorder %s2123_s26, 0  ;;  %p166_p7 = scmp.eq.s32.totalorder %s2123_s26, 5 }
  0x14   : > { %s4322_s29 = smov (%p36_p4, %s4320_s29), 0  ;;  %p172_p10 = scmp.eq.s32.totalorder %s2124_s27, 5 }
  0x15   : > { %s4124_s8 = scalar_select %p2981_p6, 1, 0 }
  0x16   : > { %4125 = sst [smem:[#allocation26_spill]] %s4322_s29  ;;  %p2989_p8 = por %p2981_p6, %p56_p5 }
  0x17   : > { %p2993_p9 = por %p166_p7, %p50_p1  ;;  %s39_s11 = ssub.s32 %s2864_s24, %s4322_s29 }
  0x18   : > { %s4126_s9 = scalar_select %p2989_p8, 1, 0 }
  0x19   : > { %s4127_s10 = scalar_select %p2993_p9, 1, 0 }
  0x1a   : > { %s40_s12 = sor.u32 %s39_s11, %s38_s6  ;;  %p2125_p11 = scmp.ge.s32.totalorder %s2868_s25, 1 }
  0x1b   : > { %p41_p12 = scmp.eq.s32.totalorder %s40_s12, 0  ;;  %p3000_p13 = por %p172_p10, %p56_p5 }
  0x1c   : > { %p179_p0 = scmp.lt.s32.totalorder %s2868_s25, 7  ;;  %s2870_s16 = smov [#allocation12]  }
  0x1d   : > { %s4128_s13 = scalar_select %p3000_p13, 1, 0 }
  0x1e   : > { %s3006_s14 = scalar_select %p41_p12, %s2848_s20, %s43_s30  }
  0x1f   : > { %4129 = sst [smem:[#allocation27_spill]] %s4128_s13  ;;  %p3008_p2 = pnand %p2125_p11, %p179_p0 }
  0x20   : > { %4130 = sst [smem:[#allocation28_spill]] %s3006_s14  ;;  %s191_s17 = sshll.u32 %s2870_s16, 4  ;;  %s192_s17 = int_to_ptr.vmem [resolvable:$true] %s191_s17 }
  0x21   : > { %s4131_s15 = scalar_select %p3008_p2, 1, 0 }
  0x22   : > { %p2412_p1 = pneg %p3008_p2  ;;  %s2871_s27 = smov [#allocation14]  }
  0x23   : > { %s204_s30 = sshll.u32 %s2871_s27, 4  ;;  %s2738_s12 = scalar_lea.hbm %s4062_s1, 12288  ;;  %s3020_s30 = int_to_ptr.vmem [resolvable:$true] %s204_s30 }
  0x24   : > { %p3016_p4 = pnand %p2412_p1, %p2981_p6  ;;  %p2739_p5 = scmp.ne.s32.totalorder %s4062_s1, %s2738_s12 }
  0x25   : > { %p2745_p12 = scmp.lt.u32.totalorder %s2738_s12, %s4062_s1 }
  0x26   : > { %p2740_p7 = pneg %p3016_p4 }
  0x28   : > { %p2741_p10 = pnand %p2740_p7, %p2739_p5 }
  0x2a   : > { %p2742_p11 = pneg %p2741_p10 }
  0x2c   : > { %p2747_p0 = pnand %p2745_p12, %p2742_p11 }
  0x2e   : > { %2750 = shalt.err (!%p2747_p0)
}
  0x2f   : > { %s2751_s27 = scalar_lea.vmem %s192_s17, 12288  ;;  %p2759_p6 = scmp.lt.s32.totalorder %s192_s17, %s192_s17 }
  0x30   : > { %p2752_p1 = scmp.ne.s32.totalorder %s192_s17, %s2751_s27  ;;  %p2760_p8 = scmp.lt.s32.totalorder %s2751_s27, %s2751_s27 }
  0x32   : > { %p2754_p13 = pnand %p2752_p1, %p2740_p7  ;;  %p2761_p2 = por %p2760_p8, %p2759_p6 }
  0x34   : > { %p2755_p9 = pneg %p2754_p13 }
  0x36   : > { %p2762_p3 = pnand %p2761_p2, %p2755_p9 }
  0x38   : > { %2765 = shalt.err (!%p2762_p3)
}
  0x39   : > { %s2872_s29 = smov 768   ;;  %s2873_s6 = smov 48  }
  0x3a   : > { %2415 = dma.hbm_to_vmem [thread:$0]  (!%p3016_p4), %s4062_s1, 12288, %s192_s17, [#allocation13], %s2872_s29, %s2872_s29, %s2873_s6  }
  0x3b   : > { %s2766_s16 = scalar_lea.hbm %s4063_s2, 2048 }
  0x3c   : > { %p2767_p13 = scmp.ne.s32.totalorder %s4063_s2, %s2766_s16  ;;  %p2773_p8 = scmp.lt.u32.totalorder %s2766_s16, %s4063_s2 }
  0x3e   : > { %p2769_p3 = pnand %p2767_p13, %p2740_p7 }
  0x40   : > { %p2770_p6 = pneg %p2769_p3 }
  0x42   : > { %p2775_p9 = pnand %p2773_p8, %p2770_p6 }
  0x44   : > { %2778 = shalt.err (!%p2775_p9)
}
  0x45   : > { %s2779_s17 = scalar_lea.vmem %s3020_s30, 2048  ;;  %p2787_p11 = scmp.lt.s32.totalorder %s3020_s30, %s3020_s30 }
  0x46   : > { %p2780_p2 = scmp.ne.s32.totalorder %s3020_s30, %s2779_s17  ;;  %p2788_p12 = scmp.lt.s32.totalorder %s2779_s17, %s2779_s17 }
  0x48   : > { %p2782_p5 = pnand %p2780_p2, %p2740_p7  ;;  %p2789_p0 = por %p2788_p12, %p2787_p11 }
  0x4a   : > { %p2783_p10 = pneg %p2782_p5 }
  0x4c   : > { %p2790_p1 = pnand %p2789_p0, %p2783_p10 }
  0x4e   : > { %2793 = shalt.err (!%p2790_p1)
}
  0x4f   : > { %s2874_s5 = smov 128   ;;  %s2875_s18 = smov 8  }
  0x50   : > { %2418 = dma.hbm_to_vmem [thread:$0]  (!%p3016_p4), %s4063_s2, 2048, %s3020_s30, [#allocation13], %s2874_s5, %s2874_s5, %s2875_s18  }
  0x51   : > { %p2128_p13 = scmp.ge.s32.totalorder %s2868_s25, 6 }
  0x53   : > { %220 = sbr.rel (%p2128_p13) target bundleno = 107 (0x6b), region = 32 }
  0x5a   : > { %s224_s6 = sand.u32 1, %s2848_s20   ;;  %s2131_s28 = sshll.u32 %s2864_s24, 1 }
  0x5b   : > { %s2129_s14 = sshll.u32 %s224_s6, 7  ;;  %s2169_s11 = sshll.u32 %s2860_s23, 5 }
  0x5c   : > { %s235_s26 = sadd.s32 %s2169_s11, %s2131_s28  ;;  %s228_s12 = scalar_lea.vmem [#allocation9], %s2129_s14 }
  0x5d   : > { %s250_s16 = sshll.u32 %s228_s12, 4  ;;  %s2133_s30 = sshll.u32 %s235_s26, 7  ;;  %s251_s16 = int_to_ptr.vmem [resolvable:$true] %s250_s16 }
  0x5e   : > { %p4133_p4 = scmp.ne.s32.totalorder %s4123_s7, 0  ;;  %s2876_s17 = smov 512  }
  0x5f   : > { %s2877_s18 = smov 256   ;;  %s2878_s13 = smov 2  }
  0x60   : > { %s2391_s27 = scalar_select %p4133_p4, [#allocation0], [#allocation20] }
  0x61   : > { %2392 = sst [smem:[#allocation17]] (%p4133_p4), %s2876_s17  ;;  %s2879_s29 = smov 128  }
  0x62   : > { %s242_s5 = sld [smem:[%s2391_s27]]   ;;  %s237_s11 = scalar_lea.hbm %s4061_s0, %s2133_s30 }
  0x63   : > { %2393 = sst [smem:[#allocation17 + $0x1]] (%p4133_p4), %s2877_s18  ;;  %s2880_s26 = smov 8  }
  0x64   : > { %2394 = sst [smem:[#allocation17 + $0x2]] (%p4133_p4), %s2878_s13  ;;  %s225_s17 = scalar_lea.sflag [#allocation10], %s224_s6 }
  0x65   : > { %2395 = sst [smem:[#allocation17 + $0x3]] (%p4133_p4), %s2879_s29  ;;  %s2881_s18 = smov [#allocation16]  }
  0x66   : > { %2396 = sst [smem:[#allocation17 + $0x4]] (%p4133_p4), %s2879_s29 }
  0x67   : > { %2397 = sst [smem:[#allocation17 + $0x5]] (%p4133_p4), %s2880_s26 }
  0x68   : > { %s2134_s12 = sshll.u32 %s242_s5, 26 }
  0x69   : > { %s2135_s27 = sadd.s32 134217728, %s2134_s12 }
  0x6a   : > { %2398 = dma.general (%p4133_p4), %s237_s11, 2048, %s251_s16, %s225_s17, %s2881_s18, [#allocation17], %s2135_s27, 0  }
  0x6b PF: > { %p4134_p7 = scmp.ne.s32.totalorder %s4131_s15, 0 }
  0x6d   : > { %275 = sbr.rel (%p4134_p7) target bundleno = 777 (0x309), region = 40 }
  0x74   : > { %s3095_s13 = sand.u32 1, %s2844_s19   ;;  %p4135_p3 = scmp.ne.s32.totalorder %s4126_s9, 0 }
  0x75   : > { %s2137_s30 = sshll.u32 %s3095_s13, 7  ;;  %s278_s29 = scalar_lea.sflag [#allocation10], %s3095_s13 }
  0x76   : > { %s3099_s28 = scalar_lea.vmem [#allocation9], %s2137_s30 }
  0x77   : > { %2827 = dma.done.wait (%p4135_p3), %s278_s29, 2048  }
  0x78   : > { %2829 = vsyncadd (%p4135_p3), %s278_s29, 4294965248  ;;  %p4136_p6 = scmp.ne.s32.totalorder %s4124_s8, 0 }
  0x7a   : > { %2831 = dma.done.wait (%p4136_p6), [#allocation13], 14336  }
  0x7b   : > { %2833 = vsyncadd (%p4136_p6), [#allocation13], 4294952960  ;;  %s3109_s7 = scalar_lea.vmem [#allocation15], %s2137_s30  ;;  %p2141_p8 = scmp.ne.s32.totalorder %s2852_s21, 0 }
  0x7c   : > { %v2882_v0 = vmov (!%p2141_p8), 0.0   ;;  %v2883_v1 = vmov (!%p2141_p8), -1e+38  }
  0x7d   : > { %323 = sbr.rel (%p2141_p8) target bundleno = 132 (0x84), region = 56  ;;  %324 = vst [vmem:[#allocation6] sm:$0xff] (!%p2141_p8), %v2882_v0  ;;  %325 = vst [vmem:[#allocation6 + $0x8] sm:$0xff] (!%p2141_p8), %v2882_v0 }
  0x7e   : > { %326 = vst [vmem:[#allocation7] sm:$0xff] (!%p2141_p8), %v2882_v0  ;;  %327 = vst [vmem:[#allocation7 + $0x8] sm:$0xff] (!%p2141_p8), %v2882_v0 }
  0x7f   : > { %330 = vst [vmem:[#allocation5] sm:$0xff] (!%p2141_p8), %v2882_v0  ;;  %331 = vst [vmem:[#allocation5 + $0x8] sm:$0xff] (!%p2141_p8), %v2882_v0 }
  0x80   : > { %332 = vst [vmem:[#allocation5 + $0x10] sm:$0xff] (!%p2141_p8), %v2882_v0  ;;  %333 = vst [vmem:[#allocation5 + $0x18] sm:$0xff] (!%p2141_p8), %v2882_v0 }
  0x81   : > { %334 = vst [vmem:[#allocation5 + $0x20] sm:$0xff] (!%p2141_p8), %v2882_v0  ;;  %335 = vst [vmem:[#allocation5 + $0x28] sm:$0xff] (!%p2141_p8), %v2882_v0 }
  0x82   : > { %328 = vst [vmem:[#allocation8] sm:$0xff] (!%p2141_p8), %v2883_v1  ;;  %329 = vst [vmem:[#allocation8 + $0x8] sm:$0xff] (!%p2141_p8), %v2883_v1 }
  0x84 PF: > { %v353_v2 = vld [vmem:[#allocation12 + $0x8] sm:$0xff]  ;;  %v359_v3 = vld [vmem:[#allocation12 + $0x38] sm:$0xff]  ;;  %v352_v4 = vld [vmem:[#allocation12] sm:$0xff]  ;;  %v2884_v9 = vmov 0.0   ;;  %s1969_s16 = scalar_lea.sflag [#allocation11], %s3095_s13 }
  0x85   : > { %v2259_v5 = vpack.c.bf16 %v359_v3, %v353_v2  ;;  %v358_v6 = vld [vmem:[#allocation12 + $0x30] sm:$0xff]  ;;  %v365_v7 = vld [vmem:[#allocation12 + $0x68] sm:$0xff]  ;;  %v371_v8 = vld [vmem:[#allocation12 + $0x98] sm:$0xff]  ;;  %512 = vmatprep.mubr.f32.mxu0 %v2884_v9  ;;  %673 = vmatprep.mubr.f32.mxu1 %v2884_v9 }
  0x86   : > { %v2261_v10 = vpack.c.bf16 %v358_v6, %v352_v4  ;;  %v2263_v11 = vpack.c.bf16 %v371_v8, %v365_v7  ;;  %v364_v12 = vld [vmem:[#allocation12 + $0x60] sm:$0xff]  ;;  %v370_v13 = vld [vmem:[#allocation12 + $0x90] sm:$0xff]  ;;  %v355_v14 = vld [vmem:[#allocation12 + $0x18] sm:$0xff] }
  0x87   : > { %2260 = vmatprep.subr.bf16.mxu0 %v2259_v5  ;;  %v361_v15 = vld [vmem:[#allocation12 + $0x48] sm:$0xff]  ;;  %v383_v17 = vld [vmem:[#allocation12 + $0xf8] sm:$0xff]  ;;  %v2265_v18 = vpack.c.bf16 %v370_v13, %v364_v12  ;;  %v354_v20 = vld [vmem:[#allocation12 + $0x10] sm:$0xff] }
  0x88   : > { %v377_v16 = vld [vmem:[#allocation12 + $0xc8] sm:$0xff]  ;;  %2262 = vmatpush1.bf16.msra.mxu0 %v2261_v10  ;;  %v2291_v19 = vpack.c.bf16 %v361_v15, %v355_v14  ;;  %v360_v21 = vld [vmem:[#allocation12 + $0x40] sm:$0xff]  ;;  %v382_v25 = vld [vmem:[#allocation12 + $0xf0] sm:$0xff] }
  0x89   : > { %v376_v22 = vld [vmem:[#allocation12 + $0xc0] sm:$0xff]  ;;  %2264 = vmatprep.subr.bf16.mxu0 %v2263_v11  ;;  %v2267_v23 = vpack.c.bf16 %v383_v17, %v377_v16  ;;  %v2293_v24 = vpack.c.bf16 %v360_v21, %v354_v20  ;;  %v367_v26 = vld [vmem:[#allocation12 + $0x78] sm:$0xff]  ;;  %v373_v27 = vld [vmem:[#allocation12 + $0xa8] sm:$0xff] }
  0x8a   : > { %2292 = vmatprep.subr.bf16.mxu1 %v2291_v19  ;;  %v2295_v28 = vpack.c.bf16 %v373_v27, %v367_v26  ;;  %v389_v29 = vld [vmem:[#allocation12 + $0x128] sm:$0xff]  ;;  %v395_v30 = vld [vmem:[#allocation12 + $0x158] sm:$0xff]  ;;  %v366_v31 = vld [vmem:[#allocation12 + $0x70] sm:$0xff]  ;;  %v2269_v33 = vpack.c.bf16 %v382_v25, %v376_v22 }
  0x8b   : > { %2294 = vmatpush1.bf16.msra.mxu1 %v2293_v24  ;;  %v372_v32 = vld [vmem:[#allocation12 + $0xa0] sm:$0xff]  ;;  %v379_v36 = vld [vmem:[#allocation12 + $0xd8] sm:$0xff]  ;;  %v385_v37 = vld [vmem:[#allocation12 + $0x108] sm:$0xff]  ;;  %v2271_v38 = vpack.c.bf16 %v395_v30, %v389_v29 }
  0x8c   : > { %2266 = vmatpush1.bf16.msra.mxu0 %v2265_v18  ;;  %2296 = vmatprep.subr.bf16.mxu1 %v2295_v28  ;;  %v2297_v34 = vpack.c.bf16 %v372_v32, %v366_v31  ;;  %v388_v35 = vld [vmem:[#allocation12 + $0x120] sm:$0xff]  ;;  %v394_v39 = vld [vmem:[#allocation12 + $0x150] sm:$0xff]  ;;  %v2299_v40 = vpack.c.bf16 %v385_v37, %v379_v36  ;;  %v401_v43 = vld [vmem:[#allocation12 + $0x188] sm:$0xff] }
  0x8d   : > { %2268 = vmatprep.subr.bf16.mxu0 %v2267_v23  ;;  %v378_v41 = vld [vmem:[#allocation12 + $0xd0] sm:$0xff]  ;;  %v384_v42 = vld [vmem:[#allocation12 + $0x100] sm:$0xff]  ;;  %v407_v44 = vld [vmem:[#allocation12 + $0x1b8] sm:$0xff]  ;;  %v2273_v48 = vpack.c.bf16 %v394_v39, %v388_v35 }
  0x8e   : > { %v391_v45 = vld [vmem:[#allocation12 + $0x138] sm:$0xff]  ;;  %v2301_v46 = vpack.c.bf16 %v384_v42, %v378_v41  ;;  %v397_v47 = vld [vmem:[#allocation12 + $0x168] sm:$0xff]  ;;  %v400_v49 = vld [vmem:[#allocation12 + $0x180] sm:$0xff]  ;;  %v2275_v53 = vpack.c.bf16 %v407_v44, %v401_v43 }
  0x8f   : > { %2298 = vmatpush1.bf16.msra.mxu1 %v2297_v34  ;;  %v2303_v50 = vpack.c.bf16 %v397_v47, %v391_v45  ;;  %v390_v51 = vld [vmem:[#allocation12 + $0x130] sm:$0xff]  ;;  %v396_v52 = vld [vmem:[#allocation12 + $0x160] sm:$0xff]  ;;  %v403_v55 = vld [vmem:[#allocation12 + $0x198] sm:$0xff] }
  0x90   : > { %2270 = vmatpush1.bf16.msra.mxu0 %v2269_v33  ;;  %2300 = vmatprep.subr.bf16.mxu1 %v2299_v40  ;;  %v406_v54 = vld [vmem:[#allocation12 + $0x1b0] sm:$0xff]  ;;  %v409_v56 = vld [vmem:[#allocation12 + $0x1c8] sm:$0xff]  ;;  %v419_v58 = vld [vmem:[#allocation12 + $0x218] sm:$0xff]  ;;  %v2305_v59 = vpack.c.bf16 %v396_v52, %v390_v51 }
  0x91   : > { %2272 = vmatprep.subr.bf16.mxu0 %v2271_v38  ;;  %v413_v57 = vld [vmem:[#allocation12 + $0x1e8] sm:$0xff]  ;;  %v2277_v60 = vpack.c.bf16 %v406_v54, %v400_v49  ;;  %v412_v61 = vld [vmem:[#allocation12 + $0x1e0] sm:$0xff]  ;;  %v2307_v62 = vpack.c.bf16 %v409_v56, %v403_v55  ;;  %v402_v63 = vld [vmem:[#allocation12 + $0x190] sm:$0xff] }
  0x92   : > { %v408_v0 = vld [vmem:[#allocation12 + $0x1c0] sm:$0xff]  ;;  %v2279_v1 = vpack.c.bf16 %v419_v58, %v413_v57  ;;  %v418_v2 = vld [vmem:[#allocation12 + $0x210] sm:$0xff]  ;;  %v415_v3 = vld [vmem:[#allocation12 + $0x1f8] sm:$0xff] }
  0x93   : > { %2302 = vmatpush1.bf16.msra.mxu1 %v2301_v46  ;;  %v421_v4 = vld [vmem:[#allocation12 + $0x228] sm:$0xff]  ;;  %v431_v6 = vld [vmem:[#allocation12 + $0x278] sm:$0xff]  ;;  %v2309_v7 = vpack.c.bf16 %v408_v0, %v402_v63  ;;  %v2281_v8 = vpack.c.bf16 %v418_v2, %v412_v61  ;;  %v424_v10 = vld [vmem:[#allocation12 + $0x240] sm:$0xff] }
  0x94   : > { %2274 = vmatpush1.bf16.msra.mxu0 %v2273_v48  ;;  %2304 = vmatprep.subr.bf16.mxu1 %v2303_v50  ;;  %v425_v5 = vld [vmem:[#allocation12 + $0x248] sm:$0xff]  ;;  %v2311_v11 = vpack.c.bf16 %v421_v4, %v415_v3  ;;  %v414_v12 = vld [vmem:[#allocation12 + $0x1f0] sm:$0xff]  ;;  %v420_v13 = vld [vmem:[#allocation12 + $0x220] sm:$0xff] }
  0x95   : > { %2276 = vmatprep.subr.bf16.mxu0 %v2275_v53  ;;  %v2283_v14 = vpack.c.bf16 %v431_v6, %v425_v5  ;;  %v430_v15 = vld [vmem:[#allocation12 + $0x270] sm:$0xff]  ;;  %v427_v16 = vld [vmem:[#allocation12 + $0x258] sm:$0xff]  ;;  %v433_v17 = vld [vmem:[#allocation12 + $0x288] sm:$0xff]  ;;  %v2313_v20 = vpack.c.bf16 %v420_v13, %v414_v12 }
  0x96   : > { %v437_v18 = vld [vmem:[#allocation12 + $0x2a8] sm:$0xff]  ;;  %v443_v19 = vld [vmem:[#allocation12 + $0x2d8] sm:$0xff]  ;;  %v2285_v21 = vpack.c.bf16 %v430_v15, %v424_v10  ;;  %v436_v22 = vld [vmem:[#allocation12 + $0x2a0] sm:$0xff]  ;;  %v2315_v23 = vpack.c.bf16 %v433_v17, %v427_v16 }
  0x97   : > { %2306 = vmatpush1.bf16.msra.mxu1 %v2305_v59  ;;  %v426_v24 = vld [vmem:[#allocation12 + $0x250] sm:$0xff]  ;;  %v432_v25 = vld [vmem:[#allocation12 + $0x280] sm:$0xff]  ;;  %v2287_v26 = vpack.c.bf16 %v443_v19, %v437_v18  ;;  %v439_v28 = vld [vmem:[#allocation12 + $0x2b8] sm:$0xff] }
  0x98   : > { %2278 = vmatpush1.bf16.msra.mxu0 %v2277_v60  ;;  %2308 = vmatprep.subr.bf16.mxu1 %v2307_v62  ;;  %v442_v27 = vld [vmem:[#allocation12 + $0x2d0] sm:$0xff]  ;;  %v445_v29 = vld [vmem:[#allocation12 + $0x2e8] sm:$0xff]  ;;  %v363_v31 = vld [vmem:[#allocation12 + $0x58] sm:$0xff]  ;;  %v2317_v32 = vpack.c.bf16 %v432_v25, %v426_v24 }
  0x99   : > { %2280 = vmatprep.subr.bf16.mxu0 %v2279_v1  ;;  %v357_v30 = vld [vmem:[#allocation12 + $0x28] sm:$0xff]  ;;  %v2289_v33 = vpack.c.bf16 %v442_v27, %v436_v22  ;;  %v2319_v34 = vpack.c.bf16 %v445_v29, %v439_v28  ;;  %v438_v35 = vld [vmem:[#allocation12 + $0x2b0] sm:$0xff]  ;;  %v444_v36 = vld [vmem:[#allocation12 + $0x2e0] sm:$0xff] }
  0x9a   : > { %v2323_v37 = vpack.c.bf16 %v363_v31, %v357_v30  ;;  %v356_v38 = vld [vmem:[#allocation12 + $0x20] sm:$0xff]  ;;  %v362_v39 = vld [vmem:[#allocation12 + $0x50] sm:$0xff]  ;;  %v369_v40 = vld [vmem:[#allocation12 + $0x88] sm:$0xff]  ;;  %v2321_v42 = vpack.c.bf16 %v444_v36, %v438_v35 }
  0x9b   : > { %2310 = vmatpush1.bf16.msra.mxu1 %v2309_v7  ;;  %v375_v41 = vld [vmem:[#allocation12 + $0xb8] sm:$0xff]  ;;  %v3115_v43 = vld [vmem:[%s3099_s28] sm:$0xff]  ;;  %v2325_v44 = vpack.c.bf16 %v362_v39, %v356_v38  ;;  %v374_v47 = vld [vmem:[#allocation12 + $0xb0] sm:$0xff] }
  0x9c   : > { %2282 = vmatpush1.bf16.msra.mxu0 %v2281_v8  ;;  %2312 = vmatprep.subr.bf16.mxu1 %v2311_v11  ;;  %v2327_v45 = vpack.c.bf16 %v375_v41, %v369_v40  ;;  %v368_v46 = vld [vmem:[#allocation12 + $0x80] sm:$0xff]  ;;  %v381_v48 = vld [vmem:[#allocation12 + $0xe8] sm:$0xff]  ;;  %v387_v49 = vld [vmem:[#allocation12 + $0x118] sm:$0xff] }
  0x9d   : > { %2284 = vmatprep.subr.bf16.mxu0 %v2283_v14  ;;  %v3120_v50 = vld [vmem:[%s3099_s28 + $0x8] sm:$0xff]  ;;  %v2329_v51 = vpack.c.bf16 %v374_v47, %v368_v46  ;;  %v2331_v52 = vpack.c.bf16 %v387_v49, %v381_v48  ;;  %v380_v53 = vld [vmem:[#allocation12 + $0xe0] sm:$0xff]  ;;  %v386_v54 = vld [vmem:[#allocation12 + $0x110] sm:$0xff] }
  0x9e   : > { %v393_v55 = vld [vmem:[#allocation12 + $0x148] sm:$0xff]  ;;  %v399_v56 = vld [vmem:[#allocation12 + $0x178] sm:$0xff]  ;;  %v3127_v57 = vld [vmem:[%s3099_s28 + $0x10] sm:$0xff]  ;;  %v2333_v58 = vpack.c.bf16 %v386_v54, %v380_v53 }
  0x9f   : > { %2314 = vmatpush1.bf16.msra.mxu1 %v2313_v20  ;;  %v2335_v59 = vpack.c.bf16 %v399_v56, %v393_v55  ;;  %v392_v60 = vld [vmem:[#allocation12 + $0x140] sm:$0xff]  ;;  %v398_v61 = vld [vmem:[#allocation12 + $0x170] sm:$0xff]  ;;  %v405_v62 = vld [vmem:[#allocation12 + $0x1a8] sm:$0xff] }
  0xa0   : > { %2286 = vmatpush1.bf16.msra.mxu0 %v2285_v21  ;;  %2316 = vmatprep.subr.bf16.mxu1 %v2315_v23  ;;  %v411_v63 = vld [vmem:[#allocation12 + $0x1d8] sm:$0xff]  ;;  %v2337_v1 = vpack.c.bf16 %v398_v61, %v392_v60  ;;  %v404_v3 = vld [vmem:[#allocation12 + $0x1a0] sm:$0xff]  ;;  %v410_v4 = vld [vmem:[#allocation12 + $0x1d0] sm:$0xff] }
  0xa1   : > { %2288 = vmatprep.subr.bf16.mxu0 %v2287_v26  ;;  %v3134_v0 = vld [vmem:[%s3099_s28 + $0x18] sm:$0xff]  ;;  %v2339_v2 = vpack.c.bf16 %v411_v63, %v405_v62  ;;  %v417_v5 = vld [vmem:[#allocation12 + $0x208] sm:$0xff]  ;;  %v3141_v7 = vld [vmem:[%s3099_s28 + $0x20] sm:$0xff]  ;;  %v2341_v8 = vpack.c.bf16 %v410_v4, %v404_v3 }
  0xa2   : > { %v423_v6 = vld [vmem:[#allocation12 + $0x238] sm:$0xff]  ;;  %v416_v11 = vld [vmem:[#allocation12 + $0x200] sm:$0xff]  ;;  %v422_v12 = vld [vmem:[#allocation12 + $0x230] sm:$0xff] }
  0xa3   : > { %2318 = vmatpush1.bf16.msra.mxu1 %v2317_v32  ;;  %v2343_v10 = vpack.c.bf16 %v423_v6, %v417_v5  ;;  %v429_v13 = vld [vmem:[#allocation12 + $0x268] sm:$0xff]  ;;  %v435_v14 = vld [vmem:[#allocation12 + $0x298] sm:$0xff]  ;;  %v2345_v16 = vpack.c.bf16 %v422_v12, %v416_v11  ;;  %v428_v18 = vld [vmem:[#allocation12 + $0x260] sm:$0xff] }
  0xa4   : > { %2290 = vmatpush1.bf16.msra.mxu0 %v2289_v33  ;;  %2320 = vmatprep.subr.bf16.mxu1 %v2319_v34  ;;  %v3148_v15 = vld [vmem:[%s3099_s28 + $0x28] sm:$0xff]  ;;  %v2347_v17 = vpack.c.bf16 %v435_v14, %v429_v13  ;;  %v434_v19 = vld [vmem:[#allocation12 + $0x290] sm:$0xff]  ;;  %v447_v21 = vld [vmem:[#allocation12 + $0x2f8] sm:$0xff] }
  0xa5   : > { %2324 = vmatprep.subr.bf16.mxu0 %v2323_v37  ;;  %v441_v20 = vld [vmem:[#allocation12 + $0x2c8] sm:$0xff]  ;;  %v3155_v22 = vld [vmem:[%s3099_s28 + $0x30] sm:$0xff]  ;;  %v2349_v23 = vpack.c.bf16 %v434_v19, %v428_v18  ;;  %v440_v25 = vld [vmem:[#allocation12 + $0x2c0] sm:$0xff] }
  0xa6   : > { %v2351_v24 = vpack.c.bf16 %v447_v21, %v441_v20  ;;  %v446_v26 = vld [vmem:[#allocation12 + $0x2f0] sm:$0xff]  ;;  %v3162_v27 = vld [vmem:[%s3099_s28 + $0x38] sm:$0xff]  ;;  %v344_v29 = vld [vmem:[%s3099_s28 + $0x40] sm:$0xff] }
  0xa7   : > { %513 = vmatmul.mubr.f32.vlgmr.msra.gmra.mrb[0].mxu0 %v3115_v43  ;;  %2322 = vmatpush1.bf16.msra.mxu1 %v2321_v42  ;;  %v2353_v28 = vpack.c.bf16 %v446_v26, %v440_v25  ;;  %v345_v30 = vld [vmem:[%s3099_s28 + $0x48] sm:$0xff]  ;;  %v346_v31 = vld [vmem:[%s3099_s28 + $0x50] sm:$0xff]  ;;  %v347_v32 = vld [vmem:[%s3099_s28 + $0x58] sm:$0xff] }
  0xa8   : > { %2326 = vmatpush1.bf16.msra.mxu0 %v2325_v44  ;;  %518 = vmatprep.mubr.f32.mxu0 %v2884_v9  ;;  %v348_v33 = vld [vmem:[%s3099_s28 + $0x60] sm:$0xff]  ;;  %v349_v34 = vld [vmem:[%s3099_s28 + $0x68] sm:$0xff]  ;;  %v350_v35 = vld [vmem:[%s3099_s28 + $0x70] sm:$0xff] }
  0xa9   : > { %2328 = vmatprep.subr.bf16.mxu0 %v2327_v45  ;;  %v351_v36 = vld [vmem:[%s3099_s28 + $0x78] sm:$0xff]  ;;  %v1791_v37 = vld [vmem:[#allocation14] sm:$0xff]  ;;  %v1792_v38 = vld [vmem:[#allocation14 + $0x8] sm:$0xff] }
  0xaa   : > { %674 = vmatmul.mubr.f32.vlgmr.msra.gmra.mrb[0].mxu1 %v3115_v43  ;;  %v2355_v39 = vpack.c.bf16 %v1792_v38, %v1791_v37  ;;  %v1793_v40 = vld [vmem:[#allocation14 + $0x10] sm:$0xff]  ;;  %v1794_v41 = vld [vmem:[#allocation14 + $0x18] sm:$0xff]  ;;  %v1796_v44 = vld [vmem:[#allocation14 + $0x28] sm:$0xff] }
  0xab   : > { %519 = vmatmul.mubr.f32.gmra.mrb[2].mxu0 %v3120_v50  ;;  %679 = vmatprep.mubr.f32.mxu1 %v2884_v9  ;;  %v2359_v42 = vpack.c.bf16 %v1794_v41, %v1793_v40  ;;  %v1797_v46 = vld [vmem:[#allocation14 + $0x30] sm:$0xff]  ;;  %v1798_v47 = vld [vmem:[#allocation14 + $0x38] sm:$0xff]  ;;  %v1799_v49 = vld [vmem:[#allocation14 + $0x40] sm:$0xff] }
  0xac   : > { %524 = vmatprep.mubr.f32.mxu0 %v2884_v9  ;;  %2330 = vmatpush1.bf16.msra.mxu0 %v2329_v51  ;;  %v2367_v48 = vpack.c.bf16 %v1798_v47, %v1797_v46  ;;  %v1802_v53 = vld [vmem:[#allocation14 + $0x58] sm:$0xff]  ;;  %v1803_v55 = vld [vmem:[#allocation14 + $0x60] sm:$0xff]  ;;  %v1804_v56 = vld [vmem:[#allocation14 + $0x68] sm:$0xff] }
  0xad   : > { %2332 = vmatprep.subr.bf16.mxu0 %v2331_v52  ;;  %2356 = vmatprep.subr.bf16.mxu1 %v2355_v39  ;;  %v1801_v52 = vld [vmem:[#allocation14 + $0x50] sm:$0xff]  ;;  %v3219_v60 = vld [vmem:[%s4064_s3] ss:$0 sm:$0xff]  ;;  %v1178_v4 = vld [vmem:[#allocation8 + $0x8] sm:$0xff] }
  0xae   : > { %680 = vmatmul.mubr.f32.gmra.mrb[2].mxu1 %v3120_v50  ;;  %v2375_v54 = vpack.c.bf16 %v1802_v53, %v1801_v52  ;;  %v1177_v61 = vld [vmem:[#allocation8] sm:$0xff]  ;;  %v1123_v62 = vld [vmem:[#allocation5] sm:$0xff]  ;;  %v1222_v13 = vadd.f32 %v3219_v60, %v1178_v4 }
  0xaf   : > { %525 = vmatmul.mubr.f32.gmra.mrb[4].mxu0 %v3127_v57  ;;  %685 = vmatprep.mubr.f32.mxu1 %v2884_v9  ;;  %v1221_v63 = vadd.f32 %v3219_v60, %v1177_v61  ;;  %v1125_v5 = vld [vmem:[#allocation5 + $0x10] sm:$0xff] }
  0xb0   : > { %530 = vmatprep.mubr.f32.mxu0 %v2884_v9  ;;  %2334 = vmatpush1.bf16.msra.mxu0 %v2333_v58  ;;  %v1805_v58 = vld [vmem:[#allocation14 + $0x70] sm:$0xff] }
  0xb1   : > { %2336 = vmatprep.subr.bf16.mxu0 %v2335_v59  ;;  %2358 = vmatpush3.bf16.msra.mxu1 %v2355_v39 }
  0xb2   : > { %686 = vmatmul.mubr.f32.gmra.mrb[4].mxu1 %v3127_v57  ;;  %2360 = vmatprep.subr.bf16.mxu1 %v2359_v42 }
  0xb3   : > { %531 = vmatmul.mubr.f32.gmra.mrb[6].mxu0 %v3134_v0  ;;  %691 = vmatprep.mubr.f32.mxu1 %v2884_v9 }
  0xb4   : > { %536 = vmatprep.mubr.f32.mxu0 %v2884_v9  ;;  %2338 = vmatpush1.bf16.msra.mxu0 %v2337_v1  ;;  %v3225_v1 = vld [vmem:[%s4065_s4] ss:$0 sm:$0xff] }
  0xb5   : > { %2340 = vmatprep.subr.bf16.mxu0 %v2339_v2  ;;  %2362 = vmatpush3.bf16.msra.mxu1 %v2359_v42 }
  0xb6   : > { %692 = vmatmul.mubr.f32.gmra.mrb[6].mxu1 %v3134_v0 }
  0xb7   : > { %537 = vmatmul.mubr.f32.gmra.mrb[8].mxu0 %v3141_v7  ;;  %697 = vmatprep.mubr.f32.mxu1 %v2884_v9 }
  0xb8   : > { %542 = vmatprep.mubr.f32.mxu0 %v2884_v9  ;;  %2342 = vmatpush1.bf16.msra.mxu0 %v2341_v8  ;;  %v1124_v8 = vld [vmem:[#allocation5 + $0x8] sm:$0xff] }
  0xb9   : > { %2344 = vmatprep.subr.bf16.mxu0 %v2343_v10  ;;  %v1126_v10 = vld [vmem:[#allocation5 + $0x18] sm:$0xff] }
  0xba   : > { %698 = vmatmul.mubr.f32.gmra.mrb[8].mxu1 %v3141_v7 }
  0xbb   : > { %543 = vmatmul.mubr.f32.gmra.mrb[10].mxu0 %v3148_v15  ;;  %703 = vmatprep.mubr.f32.mxu1 %v2884_v9 }
  0xbc   : > { %548 = vmatprep.mubr.f32.mxu0 %v2884_v9  ;;  %2346 = vmatpush1.bf16.msra.mxu0 %v2345_v16 }
  0xbd   : > { %2348 = vmatprep.subr.bf16.mxu0 %v2347_v17 }
  0xbe   : > { %704 = vmatmul.mubr.f32.gmra.mrb[10].mxu1 %v3148_v15 }
  0xbf   : > { %549 = vmatmul.mubr.f32.gmra.mrb[12].mxu0 %v3155_v22  ;;  %709 = vmatprep.mubr.f32.mxu1 %v2884_v9 }
  0xc0   : > { %554 = vmatprep.mubr.f32.mxu0 %v2884_v9  ;;  %2350 = vmatpush1.bf16.msra.mxu0 %v2349_v23 }
  0xc1   : > { %2352 = vmatprep.subr.bf16.mxu0 %v2351_v24 }
  0xc2   : > { %710 = vmatmul.mubr.f32.gmra.mrb[12].mxu1 %v3155_v22 }
  0xc3   : > { %555 = vmatmul.mubr.f32.gmra.mrb[14].mxu0 %v3162_v27  ;;  %715 = vmatprep.mubr.f32.mxu1 %v2884_v9 }
  0xc4   : > { %560 = vmatprep.mubr.f32.mxu0 %v2884_v9  ;;  %2354 = vmatpush1.bf16.msra.mxu0 %v2353_v28 }
  0xc6   : > { %716 = vmatmul.mubr.f32.gmra.mrb[14].mxu1 %v3162_v27 }
  0xc7   : > { %561 = vmatmul.mubr.f32.gmra.mrb[16].mxu0 %v344_v29  ;;  %721 = vmatprep.mubr.f32.mxu1 %v2884_v9 }
  0xc8   : > { %566 = vmatprep.mubr.f32.mxu0 %v2884_v9 }
  0xca   : > { %722 = vmatmul.mubr.f32.gmra.mrb[16].mxu1 %v344_v29 }
  0xcb   : > { %567 = vmatmul.mubr.f32.gmra.mrb[18].mxu0 %v345_v30  ;;  %727 = vmatprep.mubr.f32.mxu1 %v2884_v9 }
  0xcc   : > { %572 = vmatprep.mubr.f32.mxu0 %v2884_v9 }
  0xce   : > { %728 = vmatmul.mubr.f32.gmra.mrb[18].mxu1 %v345_v30 }
  0xcf   : > { %573 = vmatmul.mubr.f32.gmra.mrb[20].mxu0 %v346_v31  ;;  %733 = vmatprep.mubr.f32.mxu1 %v2884_v9 }
  0xd0   : > { %578 = vmatprep.mubr.f32.mxu0 %v2884_v9 }
  0xd2   : > { %734 = vmatmul.mubr.f32.gmra.mrb[20].mxu1 %v346_v31 }
  0xd3   : > { %579 = vmatmul.mubr.f32.gmra.mrb[22].mxu0 %v347_v32  ;;  %739 = vmatprep.mubr.f32.mxu1 %v2884_v9 }
  0xd4   : > { %584 = vmatprep.mubr.f32.mxu0 %v2884_v9 }
  0xd6   : > { %740 = vmatmul.mubr.f32.gmra.mrb[22].mxu1 %v347_v32 }
  0xd7   : > { %585 = vmatmul.mubr.f32.gmra.mrb[24].mxu0 %v348_v33  ;;  %745 = vmatprep.mubr.f32.mxu1 %v2884_v9 }
  0xd8   : > { %590 = vmatprep.mubr.f32.mxu0 %v2884_v9 }
  0xda   : > { %746 = vmatmul.mubr.f32.gmra.mrb[24].mxu1 %v348_v33 }
  0xdb   : > { %591 = vmatmul.mubr.f32.gmra.mrb[26].mxu0 %v349_v34  ;;  %751 = vmatprep.mubr.f32.mxu1 %v2884_v9 }
  0xdc   : > { %596 = vmatprep.mubr.f32.mxu0 %v2884_v9 }
  0xde   : > { %752 = vmatmul.mubr.f32.gmra.mrb[26].mxu1 %v349_v34 }
  0xdf   : > { %597 = vmatmul.mubr.f32.gmra.mrb[28].mxu0 %v350_v35  ;;  %757 = vmatprep.mubr.f32.mxu1 %v2884_v9 }
  0xe0   : > { %602 = vmatprep.mubr.f32.mxu0 %v2884_v9 }
  0xe2   : > { %758 = vmatmul.mubr.f32.gmra.mrb[28].mxu1 %v350_v35 }
  0xe3   : > { %603 = vmatmul.mubr.f32.gmra.mrb[30].mxu0 %v351_v36  ;;  %763 = vmatprep.mubr.f32.mxu1 %v2884_v9 }
  0xe4   : > { %834 = vmatprep.mubr.f32.mxu0 %v2884_v9 }
  0xe6   : > { %764 = vmatmul.mubr.f32.gmra.mrb[30].mxu1 %v351_v36 }
  0xe7   : > { %835 = vmatmul.mubr.f32.vlgmr.msra.gmra.mrb[32].mxu0 %v3115_v43  ;;  %v1795_v43 = vld [vmem:[#allocation14 + $0x20] sm:$0xff] }
  0xe8   : > { %840 = vmatprep.mubr.f32.mxu0 %v2884_v9  ;;  %v2363_v45 = vpack.c.bf16 %v1796_v44, %v1795_v43  ;;  %v1128_v44 = vld [vmem:[#allocation5 + $0x28] sm:$0xff] }
  0xea   : > { %2364 = vmatprep.subr.bf16.mxu1 %v2363_v45 }
  0xeb   : > { %841 = vmatmul.mubr.f32.gmra.mrb[34].mxu0 %v3120_v50  ;;  %2366 = vmatpush3.bf16.msra.mxu1 %v2363_v45  ;;  %v1800_v50 = vld [vmem:[#allocation14 + $0x48] sm:$0xff] }
  0xec   : > { %846 = vmatprep.mubr.f32.mxu0 %v2884_v9  ;;  %2368 = vmatprep.subr.bf16.mxu1 %v2367_v48  ;;  %v2371_v51 = vpack.c.bf16 %v1800_v50, %v1799_v49 }
  0xef   : > { %847 = vmatmul.mubr.f32.gmra.mrb[36].mxu0 %v3127_v57  ;;  %2370 = vmatpush3.bf16.msra.mxu1 %v2367_v48  ;;  %v2379_v57 = vpack.c.bf16 %v1804_v56, %v1803_v55 }
  0xf0   : > { %852 = vmatprep.mubr.f32.mxu0 %v2884_v9  ;;  %2372 = vmatprep.subr.bf16.mxu1 %v2371_v51 }
  0xf3   : > { %853 = vmatmul.mubr.f32.gmra.mrb[38].mxu0 %v3134_v0  ;;  %2374 = vmatpush3.bf16.msra.mxu1 %v2371_v51 }
  0xf4   : > { %858 = vmatprep.mubr.f32.mxu0 %v2884_v9  ;;  %2376 = vmatprep.subr.bf16.mxu1 %v2375_v54 }
  0xf7   : > { %859 = vmatmul.mubr.f32.gmra.mrb[40].mxu0 %v3141_v7  ;;  %2378 = vmatpush3.bf16.msra.mxu1 %v2375_v54 }
  0xf8   : > { %864 = vmatprep.mubr.f32.mxu0 %v2884_v9  ;;  %2380 = vmatprep.subr.bf16.mxu1 %v2379_v57 }
  0xfb   : > { %865 = vmatmul.mubr.f32.gmra.mrb[42].mxu0 %v3148_v15  ;;  %2382 = vmatpush3.bf16.msra.mxu1 %v2379_v57 }
  0xfc   : > { %870 = vmatprep.mubr.f32.mxu0 %v2884_v9 }
  0xff   : > { %871 = vmatmul.mubr.f32.gmra.mrb[44].mxu0 %v3155_v22 }
 0x100   : > { %876 = vmatprep.mubr.f32.mxu0 %v2884_v9 }
 0x103   : > { %877 = vmatmul.mubr.f32.gmra.mrb[46].mxu0 %v3162_v27 }
 0x104   : > { %882 = vmatprep.mubr.f32.mxu0 %v2884_v9 }
 0x107   : > { %883 = vmatmul.mubr.f32.gmra.mrb[48].mxu0 %v344_v29 }
 0x108   : > { %888 = vmatprep.mubr.f32.mxu0 %v2884_v9 }
 0x10b   : > { %889 = vmatmul.mubr.f32.gmra.mrb[50].mxu0 %v345_v30 }
 0x10c   : > { %894 = vmatprep.mubr.f32.mxu0 %v2884_v9 }
 0x10f   : > { %895 = vmatmul.mubr.f32.gmra.mrb[52].mxu0 %v346_v31  ;;  %v1127_v31 = vld [vmem:[#allocation5 + $0x20] sm:$0xff] }
 0x110   : > { %900 = vmatprep.mubr.f32.mxu0 %v2884_v9 }
 0x113   : > { %901 = vmatmul.mubr.f32.gmra.mrb[54].mxu0 %v347_v32 }
 0x114   : > { %906 = vmatprep.mubr.f32.mxu0 %v2884_v9 }
 0x117   : > { %907 = vmatmul.mubr.f32.gmra.mrb[56].mxu0 %v348_v33 }
 0x118   : > { %912 = vmatprep.mubr.f32.mxu0 %v2884_v9 }
 0x11b   : > { %913 = vmatmul.mubr.f32.gmra.mrb[58].mxu0 %v349_v34 }
 0x11c   : > { %918 = vmatprep.mubr.f32.mxu0 %v2884_v9 }
 0x11f   : > { %919 = vmatmul.mubr.f32.gmra.mrb[60].mxu0 %v350_v35 }
 0x120   : > { %924 = vmatprep.mubr.f32.mxu0 %v2884_v9  ;;  %v1806_v9 = vld [vmem:[#allocation14 + $0x78] sm:$0xff] }
 0x121   : > { %v2383_v59 = vpack.c.bf16 %v1806_v9, %v1805_v58 }
 0x123   : > { %925 = vmatmul.mubr.f32.gmra.mrb[62].mxu0 %v351_v36  ;;  %2384 = vmatprep.subr.bf16.mxu1 %v2383_v59 }
 0x124   : > { %2386 = vmatpush3.bf16.msra.mxu1 %v2383_v59 }
 0x17a   : > { %v514_v0 = vpop.f32.mrb[0].mxu0 }
 0x17b   : > { %v1129_v2 = vadd.f32 %v1123_v62, %v514_v0  ;;  %v516_v3 = vpop.f32.mrb[1].mxu0 }
 0x17c   : > { %v3233_v20 = vadd.f32 %v1124_v8, %v516_v3 }
 0x17d   : > { %v1183_v6 = vadd.f32 %v3225_v1, %v1129_v2  ;;  %v3228_v7 = vmax.f32 %v1221_v63, %v1129_v2  ;;  %v675_v11 = vpop.f32.mrb[0].mxu1 }
 0x17e   : > { %v520_v12 = vpop.f32.mrb[2].mxu0  ;;  %v1131_v14 = vadd.f32 %v1125_v5, %v675_v11  ;;  %v677_v15 = vpop.f32.mrb[1].mxu1  ;;  %v1173_v11 = vld [vmem:[#allocation6] sm:$0xff] }
 0x17f   : > { %v1185_v16 = vmax.f32 %v1177_v61, %v1183_v6  ;;  %v1225_v17 = vsub.f32 %v1221_v63, %v3228_v7  ;;  %v1231_v18 = vsub.f32 %v1129_v2, %v3228_v7  ;;  %v522_v19 = vpop.f32.mrb[3].mxu0  ;;  %v1132_v21 = vadd.f32 %v1126_v10, %v520_v12 }
 0x180   : > { %v2158_v22 = vmul.f32 -1.442695, %v1131_v14  ;;  %v3237_v28 = vadd.f32 %v3219_v60, %v3228_v7  ;;  %v3246_v41 = vadd.f32 %v1127_v31, %v522_v19 }
 0x181   : > { %v1187_v23 = vsub.f32 %v1177_v61, %v1185_v16  ;;  %v1193_v24 = vsub.f32 %v1183_v6, %v1185_v16  ;;  %v1227_v25 = vmul.f32 1.442695, %v1225_v17  ;;  %v1233_v26 = vmul.f32 1.442695, %v1231_v18  ;;  %v681_v27 = vpop.f32.mrb[2].mxu1 }
 0x182   : > { %v1184_v29 = vadd.f32 %v3225_v1, %v1132_v21  ;;  %v3240_v30 = vmax.f32 %v1222_v13, %v1132_v21  ;;  %2514 = vpow2.f32 %v2158_v22  ;;  %v526_v32 = vpop.f32.mrb[4].mxu0  ;;  %v683_v33 = vpop.f32.mrb[3].mxu1  ;;  %v1134_v58 = vadd.f32 %v1128_v44, %v681_v27 }
 0x183   : > { %v1189_v34 = vmul.f32 1.442695, %v1187_v23  ;;  %v1195_v35 = vmul.f32 1.442695, %v1193_v24  ;;  %2516 = vpow2.f32 %v1233_v26  ;;  %v937_v36 = vadd.f32 %v677_v15, %v526_v32  ;;  %v3242_v37 = vpop.f32.mrb[5].mxu0 }
 0x184   : > { %2518 = vpow2.f32 %v1227_v25  ;;  %v1186_v38 = vmax.f32 %v1178_v4, %v1184_v29  ;;  %v1226_v39 = vsub.f32 %v1222_v13, %v3240_v30  ;;  %v1232_v40 = vsub.f32 %v1132_v21, %v3240_v30 }
 0x185   : > { %2520 = vpow2.f32 %v1189_v34  ;;  %v1253_v42 = vadd.f32 %v3225_v1, %v937_v36  ;;  %v3250_v43 = vmax.f32 %v3237_v28, %v937_v36  ;;  %v3252_v45 = vpop.f32.mrb[4].mxu1  ;;  %v3265_v63 = vadd.f32 %v3219_v60, %v3240_v30 }
 0x186   : > { %2522 = vpow2.f32 %v1195_v35  ;;  %v1188_v46 = vsub.f32 %v1178_v4, %v1186_v38  ;;  %v1194_v47 = vsub.f32 %v1184_v29, %v1186_v38  ;;  %v1229_v48 = vmul.f32 1.442695, %v1226_v39  ;;  %v532_v49 = vpop.f32.mrb[6].mxu0  ;;  %v689_v50 = vpop.f32.mrb[5].mxu1 }
 0x187   : > { %v1235_v51 = vmul.f32 1.442695, %v1232_v40  ;;  %v1255_v52 = vmax.f32 %v3228_v7, %v1253_v42  ;;  %v1301_v54 = vsub.f32 %v937_v36, %v3250_v43  ;;  %v3258_v55 = vpop.f32.mrb[7].mxu0  ;;  %v3269_v0 = vadd.f32 %v3219_v60, %v3250_v43  ;;  %v1174_v36 = vld [vmem:[#allocation6 + $0x8] sm:$0xff] }
 0x188   : > { %v1191_v56 = vmul.f32 1.442695, %v1188_v46  ;;  %v1197_v57 = vmul.f32 1.442695, %v1194_v47  ;;  %2524 = vpow2.f32 %v1229_v48  ;;  %v940_v2 = vadd.f32 %v683_v33, %v532_v49 }
 0x189   : > { %2526 = vpow2.f32 %v1235_v51  ;;  %v1257_v9 = vsub.f32 %v3228_v7, %v1255_v52  ;;  %v1263_v59 = vsub.f32 %v1253_v42, %v1255_v52  ;;  %v1303_v61 = vmul.f32 1.442695, %v1301_v54  ;;  %v3261_v62 = vpop.f32.mrb[6].mxu1 }
 0x18a   : > { %2528 = vpow2.f32 %v1191_v56  ;;  %v538_v3 = vpop.f32.mrb[8].mxu0  ;;  %v3271_v4 = vpop.f32.mrb[7].mxu1  ;;  %v2159_v12 = vmul.f32 -1.442695, %v1134_v58  ;;  %v1254_v13 = vadd.f32 %v3225_v1, %v940_v2  ;;  %v3277_v14 = vmax.f32 %v3265_v63, %v940_v2 }
 0x18b   : > { %2530 = vpow2.f32 %v1197_v57  ;;  %v1259_v5 = vmul.f32 1.442695, %v1257_v9  ;;  %v1265_v6 = vmul.f32 1.442695, %v1263_v59  ;;  %v943_v7 = vadd.f32 %v689_v50, %v538_v3  ;;  %v3273_v8 = vpop.f32.mrb[9].mxu0 }
 0x18c   : > { %v2515_v10 = vpop.eup %2514  ;;  %2532 = vpow2.f32 %v1303_v61  ;;  %v1256_v23 = vmax.f32 %v3240_v30, %v1254_v13  ;;  %v1302_v31 = vsub.f32 %v940_v2, %v3277_v14  ;;  %v3300_v32 = vadd.f32 %v3219_v60, %v3277_v14  ;;  %v3328_v61 = vld [vmem:[#allocation7 + $0x8] sm:$0xff] }
 0x18d   : > { %v3279_v15 = vpop.eup %2516  ;;  %v1145_v16 = vadd.f32 1.0, %v2515_v10  ;;  %2534 = vpow2.f32 %v1259_v5  ;;  %v1323_v17 = vadd.f32 %v3225_v1, %v943_v7  ;;  %v3283_v18 = vmax.f32 %v3269_v0, %v943_v7  ;;  %v3285_v19 = vpop.f32.mrb[8].mxu1  ;;  %4143 = vst [vmem:[#allocation35_spill] sm:$0xff] %v3328_v61 }
 0x18e   : > { %4137 = vst [vmem:[#allocation29_spill] sm:$0xff] %v3279_v15  ;;  %v3287_v21 = vpop.eup %2518  ;;  %v1239_v22 = vmul.f32 %v3279_v15, %v3233_v20  ;;  %2536 = vpow2.f32 %v1265_v6  ;;  %v544_v25 = vpop.f32.mrb[10].mxu0  ;;  %v1258_v38 = vsub.f32 %v3240_v30, %v1256_v23  ;;  %v1264_v39 = vsub.f32 %v1254_v13, %v1256_v23 }
 0x18f   : > { %4138 = vst [vmem:[#allocation30_spill] sm:$0xff] %v3287_v21  ;;  %v701_v26 = vpop.f32.mrb[9].mxu1  ;;  %v3294_v27 = vpop.eup %2520  ;;  %v1237_v29 = vmul.f32 %v3287_v21, %v1173_v11  ;;  %2538 = vrcp.f32 %v1145_v16  ;;  %v1305_v44 = vmul.f32 1.442695, %v1302_v31  ;;  %v1325_v46 = vmax.f32 %v3250_v43, %v1323_v17 }
 0x190   : > { %v3302_v33 = vpop.f32.mrb[11].mxu0  ;;  %v3304_v34 = vpop.eup %2522  ;;  %v1199_v35 = vmul.f32 %v3294_v27, %v1173_v11  ;;  %2540 = vpow2.f32 %v2159_v12  ;;  %v1261_v49 = vmul.f32 1.442695, %v1258_v38  ;;  %v1267_v50 = vmul.f32 1.442695, %v1264_v39 }
 0x191   : > { %v1201_v40 = vmul.f32 %v3304_v34, %v3233_v20  ;;  %v3310_v42 = vadd.f32 %v1239_v22, %v1237_v29  ;;  %v3313_v47 = vpop.f32.mrb[10].mxu1  ;;  %v1371_v30 = vsub.f32 %v943_v7, %v3283_v18  ;;  %2542 = vpow2.f32 %v1305_v44 }
 0x192   : > { %v3315_v48 = vpop.eup %2524  ;;  %v550_v52 = vpop.f32.mrb[12].mxu0  ;;  %v1327_v58 = vsub.f32 %v3250_v43, %v1325_v46  ;;  %2544 = vpow2.f32 %v1261_v49  ;;  %v1333_v3 = vsub.f32 %v1323_v17, %v1325_v46  ;;  %v946_v38 = vadd.f32 %v3271_v4, %v544_v25 }
 0x193   : > { %4139 = vst [vmem:[#allocation31_spill] sm:$0xff] %v3310_v42  ;;  %4140 = vst [vmem:[#allocation32_spill] sm:$0xff] %v3315_v48  ;;  %v707_v54 = vpop.f32.mrb[11].mxu1  ;;  %v3320_v56 = vpop.eup %2526  ;;  %v3322_v20 = vadd.f32 %v1201_v40, %v1199_v35  ;;  %v1238_v57 = vmul.f32 %v3315_v48, %v1174_v36  ;;  %v1373_v5 = vmul.f32 1.442695, %v1371_v30  ;;  %2546 = vpow2.f32 %v1267_v50 }
 0x194   : > { %4141 = vst [vmem:[#allocation33_spill] sm:$0xff] %v3320_v56  ;;  %v3326_v9 = vpop.f32.mrb[13].mxu0  ;;  %v2529_v59 = vpop.eup %2528  ;;  %v1240_v2 = vmul.f32 %v3320_v56, %v3246_v41  ;;  %v1329_v11 = vmul.f32 1.442695, %v1327_v58  ;;  %v1335_v23 = vmul.f32 1.442695, %v1333_v3  ;;  %v949_v44 = vadd.f32 %v701_v26, %v550_v52 }
 0x195   : > { %4142 = vst [vmem:[#allocation34_spill] sm:$0xff] %v3326_v9  ;;  %v2531_v6 = vpop.eup %2530  ;;  %v1200_v7 = vmul.f32 %v2529_v59, %v1174_v36  ;;  %v1206_v10 = vmul.f32 %v2529_v59, %v3328_v61  ;;  %v3333_v12 = vpop.f32.mrb[12].mxu1  ;;  %2548 = vpow2.f32 %v1373_v5  ;;  %v3348_v36 = vadd.f32 %v3219_v60, %v3283_v18 }
 0x196   : > { %4144 = vst [vmem:[#allocation36_spill] sm:$0xff] %v3333_v12  ;;  %v3335_v13 = vpop.eup %2532  ;;  %v1202_v16 = vmul.f32 %v2531_v6, %v3246_v41  ;;  %v3338_v22 = vadd.f32 %v1240_v2, %v1238_v57  ;;  %v556_v29 = vpop.f32.mrb[14].mxu0  ;;  %2550 = vpow2.f32 %v1329_v11  ;;  %v1324_v50 = vadd.f32 %v3225_v1, %v946_v38  ;;  %v3452_v12 = vld [vmem:[#allocation7] sm:$0xff] }
 0x197   : > { %v3340_v31 = vpop.f32.mrb[13].mxu1  ;;  %v3342_v17 = vpop.eup %2534  ;;  %v3344_v35 = vadd.f32 %v2531_v6, %v1206_v10  ;;  %4146 = vst [vmem:[#allocation38_spill] sm:$0xff] %v3348_v36  ;;  %2552 = vpow2.f32 %v1335_v23  ;;  %v952_v46 = vadd.f32 %v707_v54, %v556_v29  ;;  %v3362_v30 = vmax.f32 %v3300_v32, %v946_v38  ;;  %4162 = vst [vmem:[#allocation54_spill] sm:$0xff] %v3452_v12 }
 0x198   : > { %4145 = vst [vmem:[#allocation37_spill] sm:$0xff] %v3342_v17  ;;  %v3351_v39 = vpop.f32.mrb[15].mxu0  ;;  %v3353_v41 = vpop.eup %2536  ;;  %v3355_v40 = vadd.f32 %v1202_v16, %v1200_v7  ;;  %v1393_v25 = vadd.f32 %v3225_v1, %v949_v44  ;;  %v3368_v58 = vmax.f32 %v3348_v36, %v949_v44  ;;  %v3373_v59 = vmul.f32 %v3342_v17, %v3310_v42 }
 0x199   : > { %4147 = vst [vmem:[#allocation39_spill] sm:$0xff] %v3351_v39  ;;  %v3357_v49 = vpop.eup %2538  ;;  %2554 = vrcp.f32 %v3344_v35  ;;  %v3364_v57 = vpop.f32.mrb[14].mxu1  ;;  %v1394_v26 = vadd.f32 %v3225_v1, %v952_v46  ;;  %v1326_v3 = vmax.f32 %v3277_v14, %v1324_v50  ;;  %v1372_v6 = vsub.f32 %v946_v38, %v3362_v30 }
 0x19a   : > { %4148 = vst [vmem:[#allocation40_spill] sm:$0xff] %v3364_v57  ;;  %v2541_v4 = vpop.eup %2540  ;;  %4149 = vst [vmem:[#allocation41_spill] sm:$0xff] %v3368_v58  ;;  %v562_v52 = vpop.f32.mrb[16].mxu0  ;;  %v3383_v10 = vadd.f32 %v3219_v60, %v3362_v30  ;;  %v1395_v11 = vmax.f32 %v3283_v18, %v1393_v25  ;;  %v1441_v23 = vsub.f32 %v949_v44, %v3368_v58 }
 0x19b   : > { %v719_v54 = vpop.f32.mrb[15].mxu1  ;;  %v1146_v2 = vadd.f32 1.0, %v2541_v4  ;;  %v3379_v7 = vpop.f32.mrb[17].mxu0  ;;  %v1328_v4 = vsub.f32 %v3277_v14, %v1326_v3  ;;  %v1334_v5 = vsub.f32 %v1324_v50, %v1326_v3  ;;  %v1375_v38 = vmul.f32 1.442695, %v1372_v6 }
 0x19c   : > { %4150 = vst [vmem:[#allocation42_spill] sm:$0xff] %v3379_v7  ;;  %4151 = vst [vmem:[#allocation43_spill] sm:$0xff] %v3383_v10  ;;  %v3389_v29 = vpop.eup %2542  ;;  %v1397_v53 = vsub.f32 %v3283_v18, %v1395_v11  ;;  %v1403_v56 = vsub.f32 %v1393_v25, %v1395_v11  ;;  %v1443_v48 = vmul.f32 1.442695, %v1441_v23  ;;  %v1396_v61 = vmax.f32 %v3362_v30, %v1394_v26 }
 0x19d   : > { %2556 = vrcp.f32 %v1146_v2  ;;  %v3392_v51 = vpop.f32.mrb[16].mxu1  ;;  %v3394_v24 = vpop.eup %2544  ;;  %v1331_v42 = vmul.f32 1.442695, %v1328_v4  ;;  %v1337_v2 = vmul.f32 1.442695, %v1334_v5  ;;  %v3401_v50 = vmax.f32 %v3383_v10, %v952_v46 }
 0x19e   : > { %4152 = vst [vmem:[#allocation44_spill] sm:$0xff] %v3392_v51  ;;  %v568_v16 = vpop.f32.mrb[18].mxu0  ;;  %v725_v17 = vpop.f32.mrb[17].mxu1  ;;  %2558 = vpow2.f32 %v1375_v38  ;;  %v1399_v15 = vmul.f32 1.442695, %v1397_v53  ;;  %v1398_v25 = vsub.f32 %v3362_v30, %v1396_v61  ;;  %v1404_v23 = vsub.f32 %v1394_v26, %v1396_v61 }
 0x19f   : > { %v3398_v44 = vpop.eup %2546  ;;  %4153 = vst [vmem:[#allocation45_spill] sm:$0xff] %v3401_v50  ;;  %v3403_v3 = vpop.f32.mrb[19].mxu0  ;;  %v1405_v51 = vmul.f32 1.442695, %v1403_v56  ;;  %2560 = vpow2.f32 %v1443_v48  ;;  %v1442_v4 = vsub.f32 %v952_v46, %v3401_v50  ;;  %v955_v53 = vadd.f32 %v3340_v31, %v562_v52 }
 0x1a0   : > { %4154 = vst [vmem:[#allocation46_spill] sm:$0xff] %v3403_v3  ;;  %v3405_v6 = vpop.eup %2548  ;;  %2562 = vpow2.f32 %v1331_v42  ;;  %v1401_v3 = vmul.f32 1.442695, %v1398_v25  ;;  %v1501_v48 = vadd.f32 %v3219_v60, %v3368_v58  ;;  %v1407_v61 = vmul.f32 1.442695, %v1404_v23 }
 0x1a1   : > { %4155 = vst [vmem:[#allocation47_spill] sm:$0xff] %v3405_v6  ;;  %v3408_v11 = vpop.eup %2550  ;;  %v3413_v38 = vpop.f32.mrb[18].mxu1  ;;  %2564 = vpow2.f32 %v1337_v2  ;;  %v1445_v26 = vmul.f32 1.442695, %v1442_v4  ;;  %v3420_v5 = vadd.f32 %v719_v54, %v568_v16  ;;  %v1463_v2 = vadd.f32 %v3225_v1, %v955_v53 }
 0x1a2   : > { %4156 = vst [vmem:[#allocation48_spill] sm:$0xff] %v3408_v11  ;;  %4157 = vst [vmem:[#allocation49_spill] sm:$0xff] %v3413_v38  ;;  %v3415_v21 = vpop.eup %2552  ;;  %v574_v56 = vpop.f32.mrb[20].mxu0  ;;  %2566 = vpow2.f32 %v1399_v15  ;;  %v3426_v25 = vmax.f32 %v1501_v48, %v955_v53  ;;  %v1502_v15 = vadd.f32 %v3219_v60, %v3401_v50 }
 0x1a3   : > { %v731_v11 = vpop.f32.mrb[19].mxu1  ;;  %v2555_v42 = vpop.eup %2554  ;;  %2568 = vpow2.f32 %v1405_v51  ;;  %v1464_v31 = vadd.f32 %v3225_v1, %v3420_v5  ;;  %v3432_v52 = vadd.f32 %v725_v17, %v574_v56 }
 0x1a4   : > { %v3422_v46 = vpop.f32.mrb[21].mxu0  ;;  %v1212_v38 = vmul.f32 %v2555_v42, %v3344_v35  ;;  %2570 = vpow2.f32 %v1401_v3  ;;  %v1465_v35 = vmax.f32 %v3368_v58, %v1463_v2  ;;  %v1505_v51 = vsub.f32 %v1501_v48, %v3426_v25 }
 0x1a5   : > { %4158 = vst [vmem:[#allocation50_spill] sm:$0xff] %v3422_v46  ;;  %v3434_v54 = vpop.f32.mrb[20].mxu1  ;;  %2572 = vpow2.f32 %v1407_v61  ;;  %v1511_v3 = vsub.f32 %v955_v53, %v3426_v25  ;;  %v1466_v7 = vmax.f32 %v3401_v50, %v1464_v31  ;;  %v3443_v17 = vmax.f32 %v1502_v15, %v3420_v5 }
 0x1a6   : > { %4159 = vst [vmem:[#allocation51_spill] sm:$0xff] %v3434_v54  ;;  %v1214_v16 = vsub.f32 2.0, %v1212_v38  ;;  %v580_v23 = vpop.f32.mrb[22].mxu0  ;;  %v737_v4 = vpop.f32.mrb[21].mxu1  ;;  %2574 = vpow2.f32 %v1445_v26  ;;  %v1467_v61 = vsub.f32 %v3368_v58, %v1465_v35  ;;  %v1473_v54 = vsub.f32 %v1463_v2, %v1465_v35 }
 0x1a7   : > { %v3438_v46 = vpop.eup %2556  ;;  %v3445_v56 = vpop.f32.mrb[23].mxu0  ;;  %v1507_v57 = vmul.f32 1.442695, %v1505_v51  ;;  %v1513_v10 = vmul.f32 1.442695, %v1511_v3  ;;  %v1468_v39 = vsub.f32 %v3401_v50, %v1466_v7  ;;  %v1474_v26 = vsub.f32 %v1464_v31, %v1466_v7 }
 0x1a8   : > { %4160 = vst [vmem:[#allocation52_spill] sm:$0xff] %v3445_v56  ;;  %v1216_v38 = vmul.f32 %v2555_v42, %v1214_v16  ;;  %v3448_v48 = vpop.eup %2558  ;;  %v1506_v53 = vsub.f32 %v1502_v15, %v3443_v17  ;;  %v1469_v16 = vmul.f32 1.442695, %v1467_v61  ;;  %v1475_v2 = vmul.f32 1.442695, %v1473_v54 }
 0x1a9   : > { %4161 = vst [vmem:[#allocation53_spill] sm:$0xff] %v3448_v48  ;;  %v3454_v36 = vpop.f32.mrb[22].mxu1  ;;  %v3456_v9 = vpop.eup %2560  ;;  %2576 = vpow2.f32 %v1507_v57  ;;  %v1205_v7 = vmul.f32 %v3294_v27, %v3452_v12  ;;  %v1471_v15 = vmul.f32 1.442695, %v1468_v39  ;;  %v1571_v57 = vadd.f32 %v3219_v60, %v3426_v25 }
 0x1aa   : > { %4163 = vst [vmem:[#allocation55_spill] sm:$0xff] %v3454_v36  ;;  %4164 = vst [vmem:[#allocation56_spill] sm:$0xff] %v3456_v9  ;;  %v3459_v42 = vmul.f32 %v1216_v38, %v3355_v40  ;;  %v586_v35 = vpop.f32.mrb[24].mxu0  ;;  %v3461_v51 = vpop.f32.mrb[23].mxu1  ;;  %2578 = vpow2.f32 %v1513_v10  ;;  %v1512_v36 = vsub.f32 %v3420_v5, %v3443_v17  ;;  %v1533_v40 = vadd.f32 %v3225_v1, %v3432_v52 }
 0x1ab   : > { %v3463_v3 = vpop.eup %2562  ;;  %v3475_v54 = vpop.f32.mrb[25].mxu0  ;;  %2580 = vpow2.f32 %v1469_v16  ;;  %v1477_v10 = vmul.f32 1.442695, %v1474_v26  ;;  %v3479_v61 = vadd.f32 %v731_v11, %v580_v23  ;;  %v1572_v27 = vadd.f32 %v3219_v60, %v3443_v17 }
 0x1ac   : > { %4165 = vst [vmem:[#allocation57_spill] sm:$0xff] %v3463_v3  ;;  %v3467_v31 = vpop.eup %2564  ;;  %4167 = vst [vmem:[#allocation59_spill] sm:$0xff] %v3475_v54  ;;  %2582 = vpow2.f32 %v1475_v2  ;;  %v1509_v56 = vmul.f32 1.442695, %v1506_v53  ;;  %v1535_v3 = vmax.f32 %v3426_v25, %v1533_v40  ;;  %v3489_v12 = vmax.f32 %v1571_v57, %v3432_v52 }
 0x1ad   : > { %4166 = vst [vmem:[#allocation58_spill] sm:$0xff] %v3467_v31  ;;  %v3477_v38 = vpop.eup %2566  ;;  %v3483_v39 = vpop.f32.mrb[24].mxu1  ;;  %v1515_v11 = vmul.f32 1.442695, %v1512_v36  ;;  %v1534_v23 = vadd.f32 %v3225_v1, %v3479_v61  ;;  %v3496_v26 = vmax.f32 %v1572_v27, %v3479_v61  ;;  %2584 = vpow2.f32 %v1471_v15 }
 0x1ae   : > { %4168 = vst [vmem:[#allocation60_spill] sm:$0xff] %v3477_v38  ;;  %4169 = vst [vmem:[#allocation61_spill] sm:$0xff] %v3483_v39  ;;  %v3485_v5 = vpop.eup %2568  ;;  %v592_v54 = vpop.f32.mrb[26].mxu0  ;;  %v3498_v39 = vadd.f32 %v737_v4, %v586_v35  ;;  %v1537_v50 = vsub.f32 %v3426_v25, %v1535_v3  ;;  %v1543_v9 = vsub.f32 %v1533_v40, %v1535_v3  ;;  %2586 = vpow2.f32 %v1477_v10 }
 0x1af   : > { %4170 = vst [vmem:[#allocation62_spill] sm:$0xff] %v3485_v5  ;;  %v749_v38 = vpop.f32.mrb[25].mxu1  ;;  %v3491_v16 = vpop.eup %2570  ;;  %v1575_v58 = vsub.f32 %v1571_v57, %v3489_v12  ;;  %v1581_v36 = vsub.f32 %v3432_v52, %v3489_v12  ;;  %v1536_v5 = vmax.f32 %v3443_v17, %v1534_v23  ;;  %v1576_v4 = vsub.f32 %v1572_v27, %v3496_v26 }
 0x1b0   : > { %4171 = vst [vmem:[#allocation63_spill] sm:$0xff] %v3491_v16  ;;  %v3500_v2 = vpop.f32.mrb[27].mxu0  ;;  %v3502_v53 = vpop.eup %2572  ;;  %2588 = vpow2.f32 %v1509_v56  ;;  %v1545_v15 = vmul.f32 1.442695, %v1543_v9  ;;  %v1582_v25 = vsub.f32 %v3479_v61, %v3496_v26  ;;  %v3518_v57 = vadd.f32 %v3304_v34, %v1205_v7 }
 0x1b1   : > { %4172 = vst [vmem:[#allocation64_spill] sm:$0xff] %v3500_v2  ;;  %4173 = vst [vmem:[#allocation65_spill] sm:$0xff] %v3502_v53  ;;  %v3506_v16 = vpop.eup %2574  ;;  %v3512_v35 = vpop.f32.mrb[26].mxu1  ;;  %v1539_v2 = vmul.f32 1.442695, %v1537_v50  ;;  %2590 = vpow2.f32 %v1515_v11  ;;  %v1538_v3 = vsub.f32 %v3443_v17, %v1536_v5  ;;  %v1544_v40 = vsub.f32 %v1534_v23, %v1536_v5 }
 0x1b2   : > { %4174 = vst [vmem:[#allocation66_spill] sm:$0xff] %v3506_v16  ;;  %4175 = vst [vmem:[#allocation67_spill] sm:$0xff] %v3512_v35  ;;  %v598_v52 = vpop.f32.mrb[28].mxu0  ;;  %v755_v10 = vpop.f32.mrb[27].mxu1  ;;  %v1577_v27 = vmul.f32 1.442695, %v1575_v58  ;;  %v1603_v50 = vadd.f32 %v3225_v1, %v3498_v39  ;;  %v1641_v9 = vadd.f32 %v3219_v60, %v3489_v12  ;;  %v3532_v7 = vmul.f32 %v3438_v46, %v3459_v42 }
 0x1b3   : > { %v3520_v16 = vpop.eup %2576  ;;  %2592 = vpow2.f32 %v1539_v2  ;;  %v3526_v56 = vpop.f32.mrb[29].mxu0  ;;  %v1583_v17 = vmul.f32 1.442695, %v1581_v36  ;;  %v1579_v34 = vmul.f32 1.442695, %v1576_v4  ;;  %v3541_v2 = vadd.f32 %v3461_v51, %v592_v54 }
 0x1b4   : > { %4176 = vst [vmem:[#allocation68_spill] sm:$0xff] %v3520_v16  ;;  %4177 = vst [vmem:[#allocation69_spill] sm:$0xff] %v3526_v56  ;;  %v3528_v61 = vpop.eup %2578  ;;  %2594 = vpow2.f32 %v1545_v15  ;;  %v1541_v58 = vmul.f32 1.442695, %v1538_v3  ;;  %v1605_v11 = vmax.f32 %v3489_v12, %v1603_v50  ;;  %v3538_v23 = vmax.f32 %v1641_v9, %v3498_v39 }
 0x1b5   : > { %4178 = vst [vmem:[#allocation70_spill] sm:$0xff] %v3528_v61  ;;  %v3534_v5 = vpop.f32.mrb[28].mxu1  ;;  %v3543_v15 = vpop.eup %2580  ;;  %v1547_v36 = vmul.f32 1.442695, %v1544_v40  ;;  %v1642_v46 = vadd.f32 %v3219_v60, %v3496_v26  ;;  %v3547_v42 = vadd.f32 %v749_v38, %v598_v52  ;;  %2596 = vpow2.f32 %v1577_v27 }
 0x1b6   : > { %4179 = vst [vmem:[#allocation71_spill] sm:$0xff] %v3534_v5  ;;  %v604_v56 = vpop.f32.mrb[30].mxu0  ;;  %v761_v35 = vpop.f32.mrb[29].mxu1  ;;  %4180 = vst [vmem:[#allocation72_spill] sm:$0xff] %v3543_v15  ;;  %v1607_v51 = vsub.f32 %v3489_v12, %v1605_v11  ;;  %v1613_v54 = vsub.f32 %v1603_v50, %v1605_v11  ;;  %v1645_v16 = vsub.f32 %v1641_v9, %v3538_v23  ;;  %2598 = vpow2.f32 %v1583_v17 }
 0x1b7   : > { %v3549_v4 = vadd.f32 %v755_v10, %v604_v56  ;;  %v3551_v3 = vpop.f32.mrb[31].mxu0  ;;  %1153 = vst [vmem:[#allocation5] sm:$0xff] %v761_v35  ;;  %v3553_v5 = vpop.eup %2582  ;;  %v1651_v40 = vsub.f32 %v3498_v39, %v3538_v23  ;;  %v1604_v38 = vadd.f32 %v3225_v1, %v3541_v2  ;;  %v3562_v52 = vmax.f32 %v1642_v46, %v3541_v2 }
 0x1b8   : > { %4181 = vst [vmem:[#allocation73_spill] sm:$0xff] %v3551_v3  ;;  %4182 = vst [vmem:[#allocation74_spill] sm:$0xff] %v3553_v5  ;;  %v3566_v35 = vpop.eup %2584  ;;  %2600 = vpow2.f32 %v1541_v58  ;;  %v1585_v27 = vmul.f32 1.442695, %v1582_v25  ;;  %v1609_v50 = vmul.f32 1.442695, %v1607_v51  ;;  %v1673_v25 = vadd.f32 %v3225_v1, %v3547_v42 }
 0x1b9   : > { %v3564_v10 = vpop.f32.mrb[30].mxu1  ;;  %4184 = vst [vmem:[#allocation76_spill] sm:$0xff] %v3566_v35  ;;  %v3568_v12 = vpop.eup %2586  ;;  %2602 = vpow2.f32 %v1547_v36  ;;  %v1606_v9 = vmax.f32 %v3496_v26, %v1604_v38  ;;  %v1646_v39 = vsub.f32 %v1642_v46, %v3562_v52  ;;  %v3581_v58 = vadd.f32 %v3219_v60, %v3538_v23 }
 0x1ba   : > { %4183 = vst [vmem:[#allocation75_spill] sm:$0xff] %v3564_v10  ;;  %4185 = vst [vmem:[#allocation77_spill] sm:$0xff] %v3568_v12  ;;  %v836_v56 = vpop.f32.mrb[32].mxu0  ;;  %v767_v17 = vpop.f32.mrb[31].mxu1  ;;  %2604 = vrcp.f32 %v3518_v57  ;;  %v1652_v10 = vsub.f32 %v3541_v2, %v3562_v52  ;;  %v1615_v46 = vmul.f32 1.442695, %v1613_v54  ;;  %v1675_v15 = vmax.f32 %v3538_v23, %v1673_v25 }
 0x1bb   : > { %v3572_v11 = vpop.eup %2588  ;;  %v838_v36 = vpop.f32.mrb[33].mxu0  ;;  %1156 = vst [vmem:[#allocation5 + $0x18] sm:$0xff] %v767_v17  ;;  %2606 = vpow2.f32 %v1579_v34  ;;  %v1608_v3 = vsub.f32 %v3496_v26, %v1606_v9  ;;  %v1647_v2 = vmul.f32 1.442695, %v1645_v16  ;;  %v1713_v12 = vmax.f32 %v3581_v58, %v3547_v42 }
 0x1bc   : > { %4186 = vst [vmem:[#allocation78_spill] sm:$0xff] %v3572_v11  ;;  %v3583_v51 = vpop.eup %2590  ;;  %v1614_v11 = vsub.f32 %v1604_v38, %v1606_v9  ;;  %2608 = vpow2.f32 %v1585_v27  ;;  %v1653_v17 = vmul.f32 1.442695, %v1651_v40  ;;  %v3595_v34 = vadd.f32 %v3225_v1, %v3549_v4 }
 0x1bd   : > { %4187 = vst [vmem:[#allocation79_spill] sm:$0xff] %v3583_v51  ;;  %v3586_v35 = vpop.eup %2592  ;;  %2610 = vpow2.f32 %v1609_v50  ;;  %v1611_v54 = vmul.f32 1.442695, %v1608_v3  ;;  %v1677_v38 = vsub.f32 %v3538_v23, %v1675_v15  ;;  %v1683_v27 = vsub.f32 %v1673_v25, %v1675_v15  ;;  %1741 = vst [vmem:[#allocation8] sm:$0xff] %v1713_v12 }
 0x1be   : > { %4188 = vst [vmem:[#allocation80_spill] sm:$0xff] %v3586_v35  ;;  %v842_v61 = vpop.f32.mrb[34].mxu0  ;;  %v3591_v5 = vpop.eup %2594  ;;  %v1715_v16 = vsub.f32 %v3581_v58, %v1713_v12  ;;  %2612 = vpow2.f32 %v1615_v46  ;;  %v1617_v9 = vmul.f32 1.442695, %v1614_v11  ;;  %v1721_v35 = vsub.f32 %v3547_v42, %v1713_v12 }
 0x1bf   : > { %4189 = vst [vmem:[#allocation81_spill] sm:$0xff] %v3591_v5  ;;  %v844_v26 = vpop.f32.mrb[35].mxu0  ;;  %v1676_v50 = vmax.f32 %v3562_v52, %v3595_v34  ;;  %v3602_v40 = vpop.eup %2596  ;;  %2614 = vpow2.f32 %v1647_v2  ;;  %v1649_v1 = vmul.f32 1.442695, %v1646_v39  ;;  %v3606_v3 = vadd.f32 %v3219_v60, %v3562_v52 }
 0x1c0   : > { %v3608_v23 = vpop.eup %2598  ;;  %2616 = vpow2.f32 %v1653_v17  ;;  %v1655_v15 = vmul.f32 1.442695, %v1652_v10  ;;  %v938_v39 = vadd.f32 %v836_v56, %v3242_v37  ;;  %v939_v60 = vadd.f32 %v838_v36, %v3252_v45 }
 0x1c1   : > { %4190 = vst [vmem:[#allocation82_spill] sm:$0xff] %v3608_v23  ;;  %v1678_v25 = vsub.f32 %v3562_v52, %v1676_v50  ;;  %v1684_v11 = vsub.f32 %v3595_v34, %v1676_v50  ;;  %2618 = vpow2.f32 %v1611_v54  ;;  %v3616_v58 = vmax.f32 %v3606_v3, %v3549_v4 }
 0x1c2   : > { %v848_v42 = vpop.f32.mrb[36].mxu0  ;;  %v3612_v12 = vpop.eup %2600  ;;  %2620 = vpow2.f32 %v1617_v9  ;;  %v1679_v10 = vmul.f32 1.442695, %v1677_v38  ;;  %v941_v52 = vadd.f32 %v842_v61, %v3258_v55  ;;  %v1685_v34 = vmul.f32 1.442695, %v1683_v27 }
 0x1c3   : > { %4191 = vst [vmem:[#allocation83_spill] sm:$0xff] %v3612_v12  ;;  %v850_v46 = vpop.f32.mrb[37].mxu0  ;;  %v3620_v2 = vpop.eup %2602  ;;  %1742 = vst [vmem:[#allocation8 + $0x8] sm:$0xff] %v3616_v58  ;;  %v1271_v37 = vmul.f32 %v3353_v41, %v938_v39  ;;  %2622 = vpow2.f32 %v1649_v1  ;;  %v4194_v55 = vsub.f32 %v3237_v28, %v3250_v43  ;;  %v3636_v38 = vmul.f32 %v3335_v13, %v938_v39 }
 0x1c4   : > { %4192 = vst [vmem:[#allocation84_spill] sm:$0xff] %v3620_v2  ;;  %v2605_v17 = vpop.eup %2604  ;;  %2624 = vpow2.f32 %v1655_v15  ;;  %v1717_v50 = vmul.f32 1.442695, %v1715_v16  ;;  %v1723_v54 = vmul.f32 1.442695, %v1721_v35  ;;  %v1270_v28 = vmul.f32 %v3394_v24, %v3338_v22 }
 0x1c5   : > { %v3629_v56 = vpop.eup %2606  ;;  %v1211_v36 = vmul.f32 %v2605_v17, %v3518_v57  ;;  %v1297_v61 = vmul.f32 1.442695, %v4194_v55  ;;  %v3641_v12 = vadd.f32 %v1271_v37, %v3373_v59  ;;  %2626 = vpow2.f32 %v1679_v10 }
 0x1c6   : > { %v854_v45 = vpop.f32.mrb[38].mxu0  ;;  %4193 = vst [vmem:[#allocation85_spill] sm:$0xff] %v3629_v56  ;;  %v3638_v9 = vpop.eup %2608  ;;  %v1272_v43 = vmul.f32 %v3398_v44, %v941_v52  ;;  %2628 = vpow2.f32 %v1685_v34  ;;  %v1681_v1 = vmul.f32 1.442695, %v1678_v25  ;;  %v3649_v39 = vmul.f32 %v3389_v29, %v941_v52 }
 0x1c7   : > { %v856_v27 = vpop.f32.mrb[39].mxu0  ;;  %4195 = vst [vmem:[#allocation86_spill] sm:$0xff] %v3638_v9  ;;  %4196 = vst [vmem:[#allocation87_spill] sm:$0xff] %v3641_v12  ;;  %v3643_v56 = vpop.eup %2610  ;;  %v1213_v57 = vsub.f32 2.0, %v1211_v36  ;;  %v942_v16 = vadd.f32 %v844_v26, %v3261_v62  ;;  %v4198_v10 = vsub.f32 %v3265_v63, %v3277_v14  ;;  %v944_v55 = vadd.f32 %v848_v42, %v3273_v8 }
 0x1c8   : > { %v3652_v15 = vpop.eup %2612  ;;  %v3654_v37 = vadd.f32 %v1272_v43, %v1270_v28  ;;  %2630 = vpow2.f32 %v1717_v50  ;;  %v1687_v25 = vmul.f32 1.442695, %v1684_v11  ;;  %v4199_v62 = vsub.f32 %v3269_v0, %v3283_v18 }
 0x1c9   : > { %v1215_v59 = vmul.f32 %v2605_v17, %v1213_v57  ;;  %v1299_v36 = vmul.f32 1.442695, %v4198_v10  ;;  %v3660_v34 = vpop.eup %2614  ;;  %v945_v52 = vadd.f32 %v850_v46, %v3285_v19  ;;  %2632 = vpow2.f32 %v1297_v61  ;;  %v4202_v61 = vld [vmem:[#allocation34_spill] sm:$0xff]  ;;  %v4208_v10 = vld [vmem:[#allocation36_spill] sm:$0xff] }
 0x1ca   : > { %v860_v35 = vpop.f32.mrb[40].mxu0  ;;  %4197 = vst [vmem:[#allocation88_spill] sm:$0xff] %v3654_v37  ;;  %v1367_v26 = vmul.f32 1.442695, %v4199_v62  ;;  %v3666_v17 = vpop.eup %2616  ;;  %v3670_v63 = vmul.f32 %v3415_v21, %v944_v55  ;;  %v3673_v8 = vmul.f32 %v3405_v6, %v944_v55  ;;  %2634 = vpow2.f32 %v1723_v54  ;;  %v4209_v55 = vld [vmem:[#allocation39_spill] sm:$0xff] }
 0x1cb   : > { %v862_v12 = vpop.f32.mrb[41].mxu0  ;;  %4200 = vst [vmem:[#allocation89_spill] sm:$0xff] %v3666_v17  ;;  %v1217_v57 = vmul.f32 %v1215_v59, %v3322_v20  ;;  %v3675_v14 = vpop.eup %2618  ;;  %v2144_v11 = vmul.f32 -1.442695, %v939_v60  ;;  %v947_v0 = vadd.f32 %v854_v45, %v3302_v33  ;;  %v4201_v18 = vsub.f32 %v3300_v32, %v3362_v30  ;;  %v4203_v30 = vld [vmem:[#allocation62_spill] sm:$0xff]  ;;  %v4207_v59 = vld [vmem:[#allocation56_spill] sm:$0xff] }
 0x1cc   : > { %v3681_v46 = vpop.eup %2620  ;;  %2636 = vpow2.f32 %v1299_v36  ;;  %v948_v50 = vadd.f32 %v856_v27, %v3313_v47  ;;  %v950_v28 = vadd.f32 %v860_v35, %v4202_v61  ;;  %v2145_v54 = vmul.f32 -1.442695, %v942_v16  ;;  %v4204_v45 = vld [vmem:[#allocation38_spill] sm:$0xff]  ;;  %v4205_v47 = vld [vmem:[#allocation41_spill] sm:$0xff] }
 0x1cd   : > { %v1369_v19 = vmul.f32 1.442695, %v4201_v18  ;;  %v1775_v20 = vmul.f32 %v3357_v49, %v1217_v57  ;;  %2638 = vpow2.f32 %v1681_v1  ;;  %v3687_v60 = vmul.f32 %v3467_v31, %v947_v0  ;;  %v3692_v32 = vpop.eup %2622  ;;  %v4211_v57 = vld [vmem:[#allocation45_spill] sm:$0xff] }
 0x1ce   : > { %v866_v42 = vpop.f32.mrb[42].mxu0  ;;  %v3690_v33 = vmul.f32 %v3448_v48, %v947_v0  ;;  %2640 = vpow2.f32 %v1367_v26  ;;  %v3695_v49 = vmul.f32 %v4203_v30, %v950_v28  ;;  %v4206_v27 = vsub.f32 %v4204_v45, %v4205_v47  ;;  %v3703_v16 = vpop.eup %2624  ;;  %v4210_v26 = vld [vmem:[#allocation43_spill] sm:$0xff]  ;;  %v4213_v45 = vld [vmem:[#allocation40_spill] sm:$0xff]  ;;  %v4214_v47 = vld [vmem:[#allocation42_spill] sm:$0xff] }
 0x1cf   : > { %v868_v43 = vpop.f32.mrb[43].mxu0  ;;  %2235 = vmatprep.mubr.f32.mxu1 %v1775_v20  ;;  %v3701_v1 = vmul.f32 %v4207_v59, %v950_v28  ;;  %2642 = vpow2.f32 %v2144_v11  ;;  %v951_v36 = vadd.f32 %v862_v12, %v4208_v10  ;;  %v953_v62 = vadd.f32 %v866_v42, %v4209_v55  ;;  %v3711_v61 = vpop.eup %2626  ;;  %v4215_v48 = vld [vmem:[#allocation54_spill] sm:$0xff]  ;;  %v4231_v30 = vld [vmem:[#allocation48_spill] sm:$0xff] }
 0x1d0   : > { %v1437_v35 = vmul.f32 1.442695, %v4206_v27  ;;  %2236 = vmatmul.mubr.f32.vlgmr.msra.gmra.mrb[32].mxu1 %v3532_v7  ;;  %v4212_v0 = vsub.f32 %v4210_v26, %v4211_v57  ;;  %2644 = vpow2.f32 %v1369_v19  ;;  %v954_v28 = vadd.f32 %v868_v43, %v4213_v45  ;;  %v4216_v7 = vld [vmem:[#allocation30_spill] sm:$0xff]  ;;  %v3717_v37 = vpop.eup %2628  ;;  %v4222_v45 = vld [vmem:[#allocation44_spill] sm:$0xff] }
 0x1d1   : > { %v1243_v11 = vmul.f32 %v4216_v7, %v4215_v48  ;;  %2646 = vpow2.f32 %v1687_v25  ;;  %v4217_v12 = vsub.f32 %v3606_v3, %v3616_v58  ;;  %v3723_v10 = vmul.f32 %v3502_v53, %v953_v62  ;;  %v4218_v55 = vld [vmem:[#allocation66_spill] sm:$0xff] }
 0x1d2   : > { %v1439_v18 = vmul.f32 1.442695, %v4212_v0  ;;  %v872_v20 = vpop.f32.mrb[44].mxu0  ;;  %v3726_v19 = vmul.f32 %v4218_v55, %v953_v62  ;;  %v4219_v43 = vsub.f32 %v3549_v4, %v3616_v58  ;;  %2648 = vpow2.f32 %v1437_v35  ;;  %v4220_v57 = vld [vmem:[#allocation74_spill] sm:$0xff] }
 0x1d3   : > { %v956_v27 = vadd.f32 %v872_v20, %v4214_v47  ;;  %v874_v59 = vpop.f32.mrb[45].mxu0  ;;  %v1719_v42 = vmul.f32 1.442695, %v4217_v12  ;;  %v4221_v0 = vld [vmem:[#allocation70_spill] sm:$0xff]  ;;  %v3737_v20 = vpop.eup %2630  ;;  %2650 = vpow2.f32 %v2145_v54  ;;  %v2146_v3 = vmul.f32 -1.442695, %v945_v52 }
 0x1d4   : > { %v1725_v26 = vmul.f32 1.442695, %v4219_v43  ;;  %v957_v47 = vadd.f32 %v874_v59, %v4222_v45  ;;  %v3740_v62 = vpop.eup %2632  ;;  %v2147_v12 = vmul.f32 -1.442695, %v948_v50  ;;  %2652 = vpow2.f32 %v1439_v18  ;;  %v4223_v4 = vld [vmem:[#allocation46_spill] sm:$0xff]  ;;  %v4224_v43 = vld [vmem:[#allocation29_spill] sm:$0xff] }
 0x1d5   : > { %v3732_v48 = vmul.f32 %v4220_v57, %v956_v27  ;;  %v3735_v25 = vmul.f32 %v4221_v0, %v956_v27  ;;  %v3744_v57 = vadd.f32 %v4224_v43, %v1243_v11  ;;  %v3746_v55 = vpop.eup %2634  ;;  %2654 = vpow2.f32 %v1719_v42  ;;  %v4225_v27 = vld [vmem:[#allocation31_spill] sm:$0xff]  ;;  %v4226_v0 = vld [vmem:[#allocation49_spill] sm:$0xff] }
 0x1d6   : > { %v878_v7 = vpop.f32.mrb[46].mxu0  ;;  %v1307_v54 = vmul.f32 %v3740_v62, %v4225_v27  ;;  %v2148_v52 = vmul.f32 -1.442695, %v951_v36  ;;  %v3751_v45 = vpop.eup %2636  ;;  %2656 = vpow2.f32 %v1725_v26  ;;  %v4227_v50 = vld [vmem:[#allocation77_spill] sm:$0xff]  ;;  %v2149_v26 = vmul.f32 -1.442695, %v954_v28 }
 0x1d7   : > { %v959_v58 = vadd.f32 %v878_v7, %v4223_v4  ;;  %v880_v35 = vpop.f32.mrb[47].mxu0  ;;  %v4228_v11 = vld [vmem:[#allocation37_spill] sm:$0xff]  ;;  %v3761_v43 = vpop.eup %2638  ;;  %v1308_v36 = vmul.f32 %v3751_v45, %v3338_v22  ;;  %2658 = vpow2.f32 %v2146_v3  ;;  %v4230_v27 = vld [vmem:[#allocation50_spill] sm:$0xff]  ;;  %v2150_v3 = vmul.f32 -1.442695, %v957_v47 }
 0x1d8   : > { %v960_v59 = vadd.f32 %v880_v35, %v4226_v0  ;;  %v1275_v4 = vmul.f32 %v4228_v11, %v3744_v57  ;;  %4229 = vst [vmem:[#allocation34_spill] sm:$0xff] %v3761_v43  ;;  %v1311_v42 = vadd.f32 %v3636_v38, %v1307_v54  ;;  %v3766_v35 = vpop.eup %2640  ;;  %2660 = vpow2.f32 %v2147_v12 }
 0x1d9   : > { %v3754_v18 = vmul.f32 %v4227_v50, %v959_v58  ;;  %v3757_v7 = vmul.f32 %v3583_v51, %v959_v58  ;;  %v2643_v11 = vpop.eup %2642  ;;  %v1312_v53 = vadd.f32 %v3649_v39, %v1308_v36  ;;  %2662 = vpow2.f32 %v2148_v52  ;;  %v4236_v52 = vld [vmem:[#allocation57_spill] sm:$0xff] }
 0x1da   : > { %v884_v0 = vpop.f32.mrb[48].mxu0  ;;  %v3770_v58 = vadd.f32 %v3353_v41, %v1275_v4  ;;  %v1339_v38 = vmul.f32 %v4231_v30, %v1311_v42  ;;  %v1377_v54 = vmul.f32 %v3766_v35, %v1311_v42  ;;  %v3775_v22 = vpop.eup %2644  ;;  %v4232_v41 = vld [vmem:[#allocation35_spill] sm:$0xff]  ;;  %v4233_v4 = vld [vmem:[#allocation32_spill] sm:$0xff]  ;;  %v1061_v6 = vadd.f32 1.0, %v2643_v11 }
 0x1db   : > { %v962_v50 = vadd.f32 %v884_v0, %v4230_v27  ;;  %v886_v51 = vpop.f32.mrb[49].mxu0  ;;  %v1244_v0 = vmul.f32 %v4233_v4, %v4232_v41  ;;  %v3785_v27 = vpop.eup %2646  ;;  %v1340_v36 = vmul.f32 %v4236_v52, %v1312_v53  ;;  %v1378_v47 = vmul.f32 %v3775_v22, %v1312_v53  ;;  %v4239_v41 = vld [vmem:[#allocation52_spill] sm:$0xff] }
 0x1dc   : > { %4234 = vst [vmem:[#allocation38_spill] sm:$0xff] %v3785_v27  ;;  %v3788_v39 = vadd.f32 %v3670_v63, %v1339_v38  ;;  %v1381_v42 = vadd.f32 %v3673_v8, %v1377_v54  ;;  %2664 = vpow2.f32 %v2149_v26  ;;  %v4241_v38 = vld [vmem:[#allocation60_spill] sm:$0xff]  ;;  %v2151_v26 = vmul.f32 -1.442695, %v960_v59 }
 0x1dd   : > { %v3778_v12 = vmul.f32 %v3591_v5, %v962_v50  ;;  %v3781_v28 = vmul.f32 %v3608_v23, %v962_v50  ;;  %v3793_v5 = vpop.eup %2648  ;;  %v4238_v50 = vld [vmem:[#allocation51_spill] sm:$0xff]  ;;  %v3800_v63 = vadd.f32 %v3687_v60, %v1340_v36  ;;  %v1382_v8 = vadd.f32 %v3690_v33, %v1378_v47 }
 0x1de   : > { %4235 = vst [vmem:[#allocation41_spill] sm:$0xff] %v3788_v39  ;;  %v890_v43 = vpop.f32.mrb[50].mxu0  ;;  %4237 = vst [vmem:[#allocation36_spill] sm:$0xff] %v3793_v5  ;;  %v3796_v23 = vadd.f32 %v886_v51, %v4238_v50  ;;  %v2651_v31 = vpop.eup %2650  ;;  %v1409_v54 = vmul.f32 %v4241_v38, %v1381_v42  ;;  %v1447_v53 = vmul.f32 %v3793_v5, %v1381_v42  ;;  %2666 = vpow2.f32 %v2150_v3  ;;  %v4244_v36 = vld [vmem:[#allocation63_spill] sm:$0xff]  ;;  %v4245_v3 = vld [vmem:[#allocation33_spill] sm:$0xff] }
 0x1df   : > { %v965_v4 = vadd.f32 %v890_v43, %v4239_v41  ;;  %v892_v27 = vpop.f32.mrb[51].mxu0  ;;  %4240 = vst [vmem:[#allocation39_spill] sm:$0xff] %v3800_v63  ;;  %v3805_v39 = vpop.eup %2652  ;;  %v1410_v50 = vmul.f32 %v4244_v36, %v1382_v8  ;;  %2668 = vrcp.f32 %v1061_v6  ;;  %v1062_v42 = vadd.f32 1.0, %v2651_v31  ;;  %v4249_v31 = vld [vmem:[#allocation55_spill] sm:$0xff] }
 0x1e0   : > { %4242 = vst [vmem:[#allocation43_spill] sm:$0xff] %v3805_v39  ;;  %v3808_v11 = vpop.eup %2654  ;;  %v3811_v43 = vadd.f32 %v3695_v49, %v1409_v54  ;;  %v1451_v60 = vadd.f32 %v3701_v1, %v1447_v53  ;;  %v1448_v33 = vmul.f32 %v3805_v39, %v1382_v8  ;;  %v4247_v54 = vld [vmem:[#allocation72_spill] sm:$0xff]  ;;  %2670 = vpow2.f32 %v2151_v26 }
 0x1e1   : > { %v1552_v51 = vmul.f32 %v3620_v2, %v965_v4  ;;  %v3816_v41 = vpop.eup %2656  ;;  %v1590_v59 = vmul.f32 %v3638_v9, %v965_v4  ;;  %v1246_v2 = vadd.f32 %v4245_v3, %v1244_v0  ;;  %v3821_v49 = vadd.f32 %v3723_v10, %v1410_v50  ;;  %v4251_v50 = vld [vmem:[#allocation76_spill] sm:$0xff] }
 0x1e2   : > { %4243 = vst [vmem:[#allocation45_spill] sm:$0xff] %v3811_v43  ;;  %v896_v47 = vpop.f32.mrb[52].mxu0  ;;  %v2659_v5 = vpop.eup %2658  ;;  %v1452_v1 = vadd.f32 %v3726_v19, %v1448_v33  ;;  %v1479_v53 = vmul.f32 %v4247_v54, %v1451_v60  ;;  %v4248_v43 = vld [vmem:[#allocation68_spill] sm:$0xff]  ;;  %v3828_v36 = vadd.f32 %v892_v27, %v4249_v31  ;;  %v4252_v19 = vld [vmem:[#allocation78_spill] sm:$0xff]  ;;  %2672 = vrcp.f32 %v1062_v42 }
 0x1e3   : > { %v898_v63 = vpop.f32.mrb[53].mxu0  ;;  %4246 = vst [vmem:[#allocation40_spill] sm:$0xff] %v3821_v49  ;;  %v1517_v8 = vmul.f32 %v4248_v43, %v1451_v60  ;;  %v2661_v39 = vpop.eup %2660  ;;  %v1276_v6 = vmul.f32 %v3394_v24, %v1246_v2  ;;  %v1063_v60 = vadd.f32 1.0, %v2659_v5  ;;  %v1313_v5 = vmul.f32 %v3740_v62, %v3744_v57 }
 0x1e4   : > { %v2663_v4 = vpop.eup %2662  ;;  %v3831_v0 = vadd.f32 %v3732_v48, %v1479_v53  ;;  %v1480_v3 = vmul.f32 %v4251_v50, %v1452_v1  ;;  %v1518_v33 = vmul.f32 %v4252_v19, %v1452_v1  ;;  %v4254_v48 = vld [vmem:[#allocation80_spill] sm:$0xff]  ;;  %v4255_v1 = vld [vmem:[#allocation59_spill] sm:$0xff]  ;;  %2674 = vrcp.f32 %v3770_v58 }
 0x1e5   : > { %v1521_v10 = vadd.f32 %v3735_v25, %v1517_v8  ;;  %v3837_v26 = vadd.f32 %v3398_v44, %v1276_v6  ;;  %v968_v9 = vadd.f32 %v896_v47, %v4255_v1  ;;  %v4256_v44 = vld [vmem:[#allocation61_spill] sm:$0xff]  ;;  %v4258_v6 = vld [vmem:[#allocation83_spill] sm:$0xff]  ;;  %2676 = vrcp.f32 %v1063_v60 }
 0x1e6   : > { %4250 = vst [vmem:[#allocation42_spill] sm:$0xff] %v3831_v0  ;;  %v902_v49 = vpop.f32.mrb[54].mxu0  ;;  %v3840_v27 = vadd.f32 %v3754_v18, %v1480_v3  ;;  %v1522_v31 = vadd.f32 %v3757_v7, %v1518_v33  ;;  %v3845_v8 = vpop.eup %2664  ;;  %v1064_v0 = vadd.f32 1.0, %v2661_v39  ;;  %v3851_v42 = vadd.f32 %v898_v63, %v4256_v44  ;;  %v4259_v39 = vld [vmem:[#allocation85_spill] sm:$0xff] }
 0x1e7   : > { %v904_v24 = vpop.f32.mrb[55].mxu0  ;;  %v1549_v53 = vmul.f32 %v4254_v48, %v1521_v10  ;;  %v1587_v25 = vmul.f32 %v3602_v40, %v1521_v10  ;;  %v1621_v57 = vmul.f32 %v3652_v15, %v968_v9  ;;  %v1659_v62 = vmul.f32 %v3666_v17, %v968_v9 }
 0x1e8   : > { %4253 = vst [vmem:[#allocation54_spill] sm:$0xff] %v3840_v27  ;;  %v1550_v10 = vmul.f32 %v4258_v6, %v1522_v31  ;;  %v3859_v33 = vpop.eup %2666  ;;  %v1588_v47 = vmul.f32 %v4259_v39, %v1522_v31  ;;  %2678 = vrcp.f32 %v3837_v26  ;;  %v1315_v60 = vadd.f32 %v3335_v13, %v1313_v5 }
 0x1e9   : > { %v3854_v18 = vadd.f32 %v3778_v12, %v1549_v53  ;;  %v1591_v7 = vadd.f32 %v3781_v28, %v1587_v25  ;;  %v3869_v53 = vpop.eup %2668  ;;  %2680 = vrcp.f32 %v1064_v0  ;;  %v2152_v27 = vmul.f32 -1.442695, %v3796_v23  ;;  %v4263_v23 = vld [vmem:[#allocation69_spill] sm:$0xff] }
 0x1ea   : > { %v908_v3 = vpop.f32.mrb[56].mxu0  ;;  %v3864_v1 = vadd.f32 %v1552_v51, %v1550_v10  ;;  %v1592_v25 = vadd.f32 %v1590_v59, %v1588_v47  ;;  %v1314_v51 = vmul.f32 %v3751_v45, %v1246_v2  ;;  %v1345_v17 = vmul.f32 %v4231_v30, %v1315_v60 }
 0x1eb   : > { %4257 = vst [vmem:[#allocation30_spill] sm:$0xff] %v3854_v18  ;;  %v910_v63 = vpop.f32.mrb[57].mxu0  ;;  %v1619_v12 = vmul.f32 %v3643_v56, %v1591_v7  ;;  %v1657_v28 = vmul.f32 %v3660_v34, %v1591_v7  ;;  %v4261_v18 = vld [vmem:[#allocation64_spill] sm:$0xff] }
 0x1ec   : > { %4260 = vst [vmem:[#allocation44_spill] sm:$0xff] %v3864_v1  ;;  %v971_v9 = vadd.f32 %v902_v49, %v4261_v18  ;;  %v2671_v1 = vpop.eup %2670  ;;  %v1620_v7 = vmul.f32 %v3675_v14, %v1592_v25  ;;  %v1658_v0 = vmul.f32 %v3692_v32, %v1592_v25  ;;  %v1316_v47 = vadd.f32 %v3389_v29, %v1314_v51  ;;  %v4262_v49 = vld [vmem:[#allocation67_spill] sm:$0xff] }
 0x1ed   : > { %v3872_v31 = vadd.f32 %v1621_v57, %v1619_v12  ;;  %v1661_v44 = vadd.f32 %v1659_v62, %v1657_v28  ;;  %v972_v18 = vadd.f32 %v904_v24, %v4262_v49  ;;  %v3884_v2 = vpop.eup %2672  ;;  %v1347_v45 = vadd.f32 %v3415_v21, %v1345_v17  ;;  %v4265_v17 = vld [vmem:[#allocation58_spill] sm:$0xff]  ;;  %v4266_v49 = vld [vmem:[#allocation71_spill] sm:$0xff] }
 0x1ee   : > { %v914_v10 = vpop.f32.mrb[58].mxu0  ;;  %v1622_v13 = vmul.f32 %v3681_v46, %v971_v9  ;;  %v1660_v5 = vmul.f32 %v3703_v16, %v971_v9  ;;  %v974_v57 = vadd.f32 %v908_v3, %v4263_v23  ;;  %v1065_v12 = vadd.f32 1.0, %v2663_v4  ;;  %v2675_v21 = vpop.eup %2674 }
 0x1ef   : > { %v916_v59 = vpop.f32.mrb[59].mxu0  ;;  %v1689_v30 = vmul.f32 %v3711_v61, %v1661_v44  ;;  %v1727_v62 = vmul.f32 %v3737_v20, %v1661_v44  ;;  %v1346_v9 = vmul.f32 %v4236_v52, %v1316_v47  ;;  %2682 = vrcp.f32 %v1347_v45  ;;  %v4267_v44 = vld [vmem:[#allocation73_spill] sm:$0xff] }
 0x1f0   : > { %v3890_v28 = vadd.f32 %v1622_v13, %v1620_v7  ;;  %v1662_v25 = vadd.f32 %v1660_v5, %v1658_v0  ;;  %v1691_v29 = vmul.f32 %v3717_v37, %v974_v57  ;;  %v1729_v24 = vmul.f32 %v3746_v55, %v974_v57  ;;  %v3899_v7 = vpop.eup %2676  ;;  %v4269_v5 = vld [vmem:[#allocation47_spill] sm:$0xff] }
 0x1f1   : > { %v1383_v51 = vmul.f32 %v3766_v35, %v1315_v60  ;;  %2684 = vpow2.f32 %v2152_v27  ;;  %v1348_v3 = vadd.f32 %v4265_v17, %v1346_v9  ;;  %v975_v23 = vadd.f32 %v910_v63, %v4266_v49  ;;  %v4270_v27 = vld [vmem:[#allocation34_spill] sm:$0xff] }
 0x1f2   : > { %4264 = vst [vmem:[#allocation46_spill] sm:$0xff] %v3890_v28  ;;  %v977_v4 = vadd.f32 %v914_v10, %v4267_v44  ;;  %v1281_v0 = vmul.f32 %v2675_v21, %v3770_v58  ;;  %v3902_v52 = vadd.f32 %v1691_v29, %v1689_v30  ;;  %v1731_v13 = vadd.f32 %v1729_v24, %v1727_v62  ;;  %v2679_v57 = vpop.eup %2678  ;;  %v4271_v58 = vld [vmem:[#allocation38_spill] sm:$0xff] }
 0x1f3   : > { %v1385_v28 = vadd.f32 %v4269_v5, %v1383_v51  ;;  %v2153_v35 = vmul.f32 -1.442695, %v3828_v36  ;;  %2686 = vrcp.f32 %v1348_v3  ;;  %v1690_v60 = vmul.f32 %v4270_v27, %v1662_v25  ;;  %v3907_v9 = vpop.eup %2680  ;;  %v4272_v44 = vld [vmem:[#allocation62_spill] sm:$0xff] }
 0x1f4   : > { %4268 = vst [vmem:[#allocation29_spill] sm:$0xff] %v3902_v52  ;;  %v1283_v63 = vsub.f32 2.0, %v1281_v0  ;;  %v1282_v10 = vmul.f32 %v2679_v57, %v3837_v26  ;;  %1737 = vst [vmem:[#allocation6] sm:$0xff] %v1731_v13  ;;  %v1692_v30 = vmul.f32 %v4271_v58, %v977_v4  ;;  %2688 = vrcp.f32 %v1065_v12  ;;  %v4273_v13 = vld [vmem:[#allocation87_spill] sm:$0xff] }
 0x1f5   : > { %v1415_v17 = vmul.f32 %v4241_v38, %v1385_v28  ;;  %v1066_v62 = vadd.f32 1.0, %v3845_v8  ;;  %v1728_v29 = vmul.f32 %v3808_v11, %v1662_v25  ;;  %v1730_v36 = vmul.f32 %v3816_v41, %v977_v4  ;;  %v4275_v4 = vld [vmem:[#allocation36_spill] sm:$0xff] }
 0x1f6   : > { %v1067_v24 = vadd.f32 1.0, %v3859_v33  ;;  %v1285_v51 = vmul.f32 %v2675_v21, %v1283_v63  ;;  %v1284_v49 = vsub.f32 2.0, %v1282_v10  ;;  %v1068_v5 = vadd.f32 1.0, %v2671_v1  ;;  %v4274_v33 = vld [vmem:[#allocation75_spill] sm:$0xff] }
 0x1f7   : > { %v1417_v0 = vadd.f32 %v4272_v44, %v1415_v17  ;;  %2690 = vpow2.f32 %v2153_v35  ;;  %v3917_v26 = vadd.f32 %v1692_v30, %v1690_v60  ;;  %v1732_v38 = vadd.f32 %v1730_v36, %v1728_v29  ;;  %v4276_v35 = vld [vmem:[#allocation88_spill] sm:$0xff]  ;;  %v4277_v30 = vld [vmem:[#allocation53_spill] sm:$0xff] }
 0x1f8   : > { %v1287_v52 = vmul.f32 %v1285_v51, %v4273_v13  ;;  %v1286_v12 = vmul.f32 %v2679_v57, %v1284_v49  ;;  %v1384_v8 = vmul.f32 %v3775_v22, %v1316_v47  ;;  %v2154_v25 = vmul.f32 -1.442695, %v3851_v42  ;;  %v4278_v47 = vld [vmem:[#allocation56_spill] sm:$0xff]  ;;  %v4280_v51 = vld [vmem:[#allocation43_spill] sm:$0xff] }
 0x1f9   : > { %2692 = vrcp.f32 %v1417_v0  ;;  %1738 = vst [vmem:[#allocation6 + $0x8] sm:$0xff] %v1732_v38  ;;  %v978_v21 = vadd.f32 %v916_v59, %v4274_v33  ;;  %v1453_v63 = vmul.f32 %v4275_v4, %v1385_v28  ;;  %v2683_v10 = vpop.eup %2682  ;;  %v2155_v17 = vmul.f32 -1.442695, %v972_v18  ;;  %v4279_v59 = vld [vmem:[#allocation63_spill] sm:$0xff]  ;;  %v4284_v33 = vld [vmem:[#allocation70_spill] sm:$0xff] }
 0x1fa   : > { %2694 = vrcp.f32 %v1066_v62  ;;  %v1777_v1 = vmul.f32 %v3869_v53, %v1287_v52  ;;  %v1288_v60 = vmul.f32 %v1286_v12, %v4276_v35  ;;  %v1386_v29 = vadd.f32 %v4277_v30, %v1384_v8  ;;  %v4283_v12 = vld [vmem:[#allocation74_spill] sm:$0xff]  ;;  %v4286_v30 = vld [vmem:[#allocation77_spill] sm:$0xff] }
 0x1fb   : > { %v2685_v57 = vpop.eup %2684  ;;  %2696 = vrcp.f32 %v1067_v24  ;;  %v1351_v36 = vmul.f32 %v2683_v10, %v1347_v45  ;;  %v2156_v22 = vmul.f32 -1.442695, %v975_v23  ;;  %v1455_v62 = vadd.f32 %v4278_v47, %v1453_v63  ;;  %v4281_v23 = vld [vmem:[#allocation65_spill] sm:$0xff] }
 0x1fc   : > { %2698 = vrcp.f32 %v1068_v5  ;;  %2238 = vmatprep.mubr.f32.mxu1 %v1777_v1  ;;  %v1778_v42 = vmul.f32 %v3884_v2, %v1288_v60  ;;  %v1416_v28 = vmul.f32 %v4279_v59, %v1386_v29  ;;  %v1454_v49 = vmul.f32 %v4280_v51, %v1386_v29  ;;  %v4282_v5 = vld [vmem:[#allocation66_spill] sm:$0xff]  ;;  %v4285_v1 = vld [vmem:[#allocation41_spill] sm:$0xff] }
 0x1fd   : > { %v2687_v53 = vpop.eup %2686  ;;  %v1353_v52 = vsub.f32 2.0, %v1351_v36  ;;  %2700 = vpow2.f32 %v2154_v25  ;;  %v1485_v18 = vmul.f32 %v4247_v54, %v1455_v62  ;;  %v1523_v44 = vmul.f32 %v4248_v43, %v1455_v62  ;;  %v4287_v36 = vld [vmem:[#allocation79_spill] sm:$0xff] }
 0x1fe   : > { %2239 = vmatmul.mubr.f32.gmra.mrb[34].mxu1 %v1778_v42  ;;  %v1352_v45 = vmul.f32 %v2687_v53, %v1348_v3  ;;  %2702 = vpow2.f32 %v2155_v17  ;;  %v1418_v24 = vadd.f32 %v4281_v23, %v1416_v28  ;;  %v1456_v38 = vadd.f32 %v4282_v5, %v1454_v49  ;;  %v2689_v13 = vpop.eup %2688  ;;  %v4288_v42 = vld [vmem:[#allocation81_spill] sm:$0xff]  ;;  %v4289_v28 = vld [vmem:[#allocation39_spill] sm:$0xff]  ;;  %v4290_v49 = vld [vmem:[#allocation82_spill] sm:$0xff] }
 0x1ff   : > { %v1355_v2 = vmul.f32 %v2683_v10, %v1353_v52  ;;  %2704 = vpow2.f32 %v2156_v22  ;;  %v1487_v8 = vadd.f32 %v4283_v12, %v1485_v18  ;;  %v1525_v4 = vadd.f32 %v4284_v33, %v1523_v44  ;;  %v4291_v44 = vld [vmem:[#allocation84_spill] sm:$0xff] }
 0x200   : > { %v1354_v63 = vsub.f32 2.0, %v1352_v45  ;;  %2706 = vrcp.f32 %v1418_v24  ;;  %v1486_v54 = vmul.f32 %v4251_v50, %v1456_v38  ;;  %v1524_v43 = vmul.f32 %v4252_v19, %v1456_v38 }
 0x201   : > { %v2691_v25 = vpop.eup %2690  ;;  %v1069_v3 = vadd.f32 1.0, %v2685_v57  ;;  %v1357_v35 = vmul.f32 %v1355_v2, %v4285_v1  ;;  %2708 = vrcp.f32 %v1487_v8  ;;  %v1555_v60 = vmul.f32 %v4254_v48, %v1525_v4  ;;  %v4292_v2 = vld [vmem:[#allocation86_spill] sm:$0xff] }
 0x202   : > { %v1356_v10 = vmul.f32 %v2687_v53, %v1354_v63  ;;  %v3942_v29 = vadd.f32 %v4286_v30, %v1486_v54  ;;  %v1526_v22 = vadd.f32 %v4287_v36, %v1524_v43  ;;  %v1593_v47 = vmul.f32 %v3602_v40, %v1525_v4  ;;  %v4293_v4 = vld [vmem:[#allocation89_spill] sm:$0xff] }
 0x203   : > { %v2693_v17 = vpop.eup %2692  ;;  %v1779_v50 = vmul.f32 %v3899_v7, %v1357_v35  ;;  %v2157_v57 = vmul.f32 -1.442695, %v978_v21  ;;  %v1557_v59 = vadd.f32 %v4288_v42, %v1555_v60  ;;  %v1070_v18 = vadd.f32 1.0, %v2691_v25  ;;  %v4294_v54 = vld [vmem:[#allocation45_spill] sm:$0xff] }
 0x204   : > { %v3946_v62 = vpop.eup %2694  ;;  %v1421_v19 = vmul.f32 %v2693_v17, %v1417_v0  ;;  %v1358_v51 = vmul.f32 %v1356_v10, %v4289_v28  ;;  %2710 = vrcp.f32 %v3942_v29  ;;  %v1556_v48 = vmul.f32 %v4258_v6, %v1526_v22  ;;  %v4295_v28 = vld [vmem:[#allocation40_spill] sm:$0xff] }
 0x205   : > { %v1595_v53 = vadd.f32 %v4290_v49, %v1593_v47  ;;  %v3954_v52 = vpop.eup %2696  ;;  %2241 = vmatprep.mubr.f32.mxu1 %v1779_v50  ;;  %2712 = vrcp.f32 %v1557_v59  ;;  %v1594_v7 = vmul.f32 %v4259_v39, %v1526_v22  ;;  %v4296_v49 = vld [vmem:[#allocation42_spill] sm:$0xff] }
 0x206   : > { %v1423_v40 = vsub.f32 2.0, %v1421_v19  ;;  %v3957_v0 = vpop.eup %2698  ;;  %v1780_v21 = vmul.f32 %v3907_v9, %v1358_v51  ;;  %v1558_v45 = vadd.f32 %v4291_v44, %v1556_v48  ;;  %2714 = vpow2.f32 %v2157_v57 }
 0x207   : > { %v1625_v23 = vmul.f32 %v3643_v56, %v1595_v53  ;;  %v1663_v6 = vmul.f32 %v3660_v34, %v1595_v53  ;;  %v2701_v5 = vpop.eup %2700  ;;  %v1596_v12 = vadd.f32 %v4292_v2, %v1594_v7 }
 0x208   : > { %v1425_v38 = vmul.f32 %v2693_v17, %v1423_v40  ;;  %v2703_v33 = vpop.eup %2702  ;;  %2242 = vmatmul.mubr.f32.gmra.mrb[36].mxu1 %v1780_v21  ;;  %2716 = vrcp.f32 %v1558_v45  ;;  %v1071_v36 = vadd.f32 1.0, %v2701_v5 }
 0x209   : > { %v3965_v39 = vadd.f32 %v3652_v15, %v1625_v23  ;;  %v1665_v63 = vadd.f32 %v4293_v4, %v1663_v6  ;;  %v2705_v9 = vpop.eup %2704  ;;  %2718 = vrcp.f32 %v1069_v3  ;;  %v1626_v56 = vmul.f32 %v3675_v14, %v1596_v12  ;;  %v4297_v23 = vld [vmem:[#allocation54_spill] sm:$0xff] }
 0x20a   : > { %v1427_v43 = vmul.f32 %v1425_v38, %v4294_v54  ;;  %v1664_v34 = vmul.f32 %v3692_v32, %v1596_v12  ;;  %v2707_v25 = vpop.eup %2706  ;;  %2720 = vrcp.f32 %v1070_v18  ;;  %v1073_v47 = vadd.f32 1.0, %v2705_v9  ;;  %v4298_v38 = vld [vmem:[#allocation30_spill] sm:$0xff]  ;;  %v4299_v54 = vld [vmem:[#allocation44_spill] sm:$0xff] }
 0x20b   : > { %v1695_v1 = vmul.f32 %v3711_v61, %v1665_v63  ;;  %v1733_v35 = vmul.f32 %v3737_v20, %v1665_v63  ;;  %v2709_v60 = vpop.eup %2708  ;;  %v1422_v15 = vmul.f32 %v2707_v25, %v1418_v24  ;;  %2722 = vrcp.f32 %v3965_v39 }
 0x20c   : > { %v1781_v17 = vmul.f32 %v2689_v13, %v1427_v43  ;;  %v1628_v10 = vadd.f32 %v3681_v46, %v1626_v56  ;;  %v1491_v3 = vmul.f32 %v2709_v60, %v1487_v8  ;;  %v1666_v32 = vadd.f32 %v3703_v16, %v1664_v34 }
 0x20d   : > { %v1697_v30 = vadd.f32 %v3717_v37, %v1695_v1  ;;  %v1735_v14 = vadd.f32 %v3746_v55, %v1733_v35  ;;  %v1424_v22 = vsub.f32 2.0, %v1422_v15  ;;  %v1072_v8 = vadd.f32 1.0, %v2703_v33 }
 0x20e   : > { %2244 = vmatprep.mubr.f32.mxu1 %v1781_v17  ;;  %2724 = vrcp.f32 %v1628_v10  ;;  %v2711_v61 = vpop.eup %2710  ;;  %v1493_v20 = vsub.f32 2.0, %v1491_v3  ;;  %v1696_v24 = vmul.f32 %v4270_v27, %v1666_v32  ;;  %v1734_v13 = vmul.f32 %v3808_v11, %v1666_v32 }
 0x20f   : > { %2726 = vrcp.f32 %v1697_v30  ;;  %1739 = vst [vmem:[#allocation7] sm:$0xff] %v1735_v14  ;;  %v2713_v46 = vpop.eup %2712  ;;  %v1426_v37 = vmul.f32 %v2707_v25, %v1424_v22  ;;  %v1492_v55 = vmul.f32 %v2711_v61, %v3942_v29 }
 0x210   : > { %v1495_v50 = vmul.f32 %v2709_v60, %v1493_v20  ;;  %v1561_v16 = vmul.f32 %v2713_v46, %v1557_v59  ;;  %v1698_v19 = vadd.f32 %v4271_v58, %v1696_v24  ;;  %v1736_v57 = vadd.f32 %v3816_v41, %v1734_v13  ;;  %v2715_v42 = vpop.eup %2714 }
 0x211   : > { %2728 = vrcp.f32 %v1071_v36  ;;  %v1428_v51 = vmul.f32 %v1426_v37, %v4295_v28  ;;  %v1494_v48 = vsub.f32 2.0, %v1492_v55  ;;  %v1074_v41 = vadd.f32 1.0, %v2715_v42  ;;  %v4300_v36 = vld [vmem:[#allocation46_spill] sm:$0xff]  ;;  %v920_v37 = vpop.f32.mrb[60].mxu0 }
 0x212   : > { %v2717_v27 = vpop.eup %2716  ;;  %v1497_v11 = vmul.f32 %v1495_v50, %v4296_v49  ;;  %v1563_v53 = vsub.f32 2.0, %v1561_v16  ;;  %2730 = vrcp.f32 %v1698_v19  ;;  %1740 = vst [vmem:[#allocation7 + $0x8] sm:$0xff] %v1736_v57  ;;  %1154 = vst [vmem:[#allocation5 + $0x8] sm:$0xff] %v920_v37  ;;  %v922_v55 = vpop.f32.mrb[61].mxu0 }
 0x213   : > { %v2719_v18 = vpop.eup %2718  ;;  %2732 = vrcp.f32 %v1072_v8  ;;  %v1782_v29 = vmul.f32 %v3946_v62, %v1428_v51  ;;  %v1496_v59 = vmul.f32 %v2711_v61, %v1494_v48  ;;  %v1562_v40 = vmul.f32 %v2717_v27, %v1558_v45  ;;  %v4301_v61 = vld [vmem:[#allocation29_spill] sm:$0xff]  ;;  %1155 = vst [vmem:[#allocation5 + $0x10] sm:$0xff] %v922_v55  ;;  %v926_v50 = vpop.f32.mrb[62].mxu0 }
 0x214   : > { %v2721_v58 = vpop.eup %2720  ;;  %2734 = vrcp.f32 %v1073_v47  ;;  %v1783_v7 = vmul.f32 %v3954_v52, %v1497_v11  ;;  %v1565_v21 = vmul.f32 %v2713_v46, %v1563_v53  ;;  %1157 = vst [vmem:[#allocation5 + $0x20] sm:$0xff] %v926_v50  ;;  %v928_v16 = vpop.f32.mrb[63].mxu0 }
 0x215   : > { %v2723_v44 = vpop.eup %2722  ;;  %2245 = vmatmul.mubr.f32.gmra.mrb[38].mxu1 %v1782_v29  ;;  %v1498_v6 = vmul.f32 %v1496_v59, %v4297_v23  ;;  %v1564_v5 = vsub.f32 2.0, %v1562_v40  ;;  %2736 = vrcp.f32 %v1074_v41  ;;  %1158 = vst [vmem:[#allocation5 + $0x28] sm:$0xff] %v928_v16 }
 0x216   : > { %2247 = vmatprep.mubr.f32.mxu1 %v1783_v7  ;;  %v1567_v2 = vmul.f32 %v1565_v21, %v4298_v38  ;;  %v1631_v12 = vmul.f32 %v2723_v44, %v3965_v39 }
 0x217   : > { %v1784_v62 = vmul.f32 %v3957_v0, %v1498_v6  ;;  %v1566_v45 = vmul.f32 %v2717_v27, %v1564_v5 }
 0x218   : > { %v2725_v33 = vpop.eup %2724  ;;  %v1785_v63 = vmul.f32 %v2719_v18, %v1567_v2  ;;  %v1633_v9 = vsub.f32 2.0, %v1631_v12 }
 0x219   : > { %v2727_v4 = vpop.eup %2726  ;;  %v1632_v52 = vmul.f32 %v2725_v33, %v1628_v10  ;;  %2248 = vmatmul.mubr.f32.gmra.mrb[40].mxu1 %v1784_v62  ;;  %v1568_v43 = vmul.f32 %v1566_v45, %v4299_v54 }
 0x21a   : > { %v1701_v56 = vmul.f32 %v2727_v4, %v1697_v30  ;;  %2250 = vmatprep.mubr.f32.mxu1 %v1785_v63  ;;  %v1635_v34 = vmul.f32 %v2723_v44, %v1633_v9 }
 0x21b   : > { %v1634_v25 = vsub.f32 2.0, %v1632_v52  ;;  %v2729_v1 = vpop.eup %2728  ;;  %v1786_v35 = vmul.f32 %v2721_v58, %v1568_v43 }
 0x21c   : > { %v1703_v60 = vsub.f32 2.0, %v1701_v56  ;;  %v2731_v39 = vpop.eup %2730  ;;  %v1637_v17 = vmul.f32 %v1635_v34, %v3872_v31 }
 0x21d   : > { %v1636_v0 = vmul.f32 %v2725_v33, %v1634_v25  ;;  %v2733_v15 = vpop.eup %2732  ;;  %2251 = vmatmul.mubr.f32.gmra.mrb[42].mxu1 %v1786_v35  ;;  %v1702_v14 = vmul.f32 %v2731_v39, %v1698_v19 }
 0x21e   : > { %v1705_v3 = vmul.f32 %v2727_v4, %v1703_v60  ;;  %v2735_v32 = vpop.eup %2734  ;;  %v1787_v10 = vmul.f32 %v2729_v1, %v1637_v17 }
 0x21f   : > { %v1638_v22 = vmul.f32 %v1636_v0, %v4300_v36  ;;  %v1704_v20 = vsub.f32 2.0, %v1702_v14  ;;  %v2737_v8 = vpop.eup %2736 }
 0x220   : > { %v1707_v30 = vmul.f32 %v1705_v3, %v4301_v61  ;;  %2253 = vmatprep.mubr.f32.mxu1 %v1787_v10 }
 0x221   : > { %v1788_v24 = vmul.f32 %v2733_v15, %v1638_v22  ;;  %v1706_v46 = vmul.f32 %v2731_v39, %v1704_v20 }
 0x222   : > { %v1789_v13 = vmul.f32 %v2735_v32, %v1707_v30 }
 0x223   : > { %2254 = vmatmul.mubr.f32.gmra.mrb[44].mxu1 %v1788_v24  ;;  %v1708_v31 = vmul.f32 %v1706_v46, %v3917_v26 }
 0x224   : > { %2256 = vmatprep.mubr.f32.mxu1 %v1789_v13 }
 0x225   : > { %v1790_v47 = vmul.f32 %v2737_v8, %v1708_v31 }
 0x227   : > { %2257 = vmatmul.mubr.f32.gmra.mrb[46].mxu1 %v1790_v47 }
 0x2a3   : > { %v2237_v19 = vpop.f32.mrb[32].mxu1 }
 0x2a4   : > { %1953 = vst [vmem:[%s3109_s7 + $0x8] sm:$0xff] %v2237_v19  ;;  %v1873_v26 = vpop.f32.mrb[33].mxu1 }
 0x2a5   : > { %1952 = vst [vmem:[%s3109_s7] sm:$0xff] %v1873_v26 }
 0x2d1   : > { %v2240_v57 = vpop.f32.mrb[34].mxu1 }
 0x2d2   : > { %1955 = vst [vmem:[%s3109_s7 + $0x18] sm:$0xff] %v2240_v57  ;;  %v1883_v42 = vpop.f32.mrb[35].mxu1 }
 0x2d3   : > { %1954 = vst [vmem:[%s3109_s7 + $0x10] sm:$0xff] %v1883_v42 }
 0x2db   : > { %v2243_v28 = vpop.f32.mrb[36].mxu1 }
 0x2dc   : > { %1957 = vst [vmem:[%s3109_s7 + $0x28] sm:$0xff] %v2243_v28  ;;  %v1893_v51 = vpop.f32.mrb[37].mxu1 }
 0x2dd   : > { %1956 = vst [vmem:[%s3109_s7 + $0x20] sm:$0xff] %v1893_v51 }
 0x2e8   : > { %v2246_v48 = vpop.f32.mrb[38].mxu1 }
 0x2e9   : > { %1959 = vst [vmem:[%s3109_s7 + $0x38] sm:$0xff] %v2246_v48  ;;  %v1903_v27 = vpop.f32.mrb[39].mxu1 }
 0x2ea   : > { %1958 = vst [vmem:[%s3109_s7 + $0x30] sm:$0xff] %v1903_v27 }
 0x2ec   : > { %v2249_v49 = vpop.f32.mrb[40].mxu1 }
 0x2ed   : > { %1961 = vst [vmem:[%s3109_s7 + $0x48] sm:$0xff] %v2249_v49  ;;  %v1913_v11 = vpop.f32.mrb[41].mxu1 }
 0x2ee   : > { %1960 = vst [vmem:[%s3109_s7 + $0x40] sm:$0xff] %v1913_v11 }
 0x2f0   : > { %v2252_v53 = vpop.f32.mrb[42].mxu1 }
 0x2f1   : > { %1963 = vst [vmem:[%s3109_s7 + $0x58] sm:$0xff] %v2252_v53  ;;  %v1923_v18 = vpop.f32.mrb[43].mxu1 }
 0x2f2   : > { %1962 = vst [vmem:[%s3109_s7 + $0x50] sm:$0xff] %v1923_v18 }
 0x2f6   : > { %v2255_v29 = vpop.f32.mrb[44].mxu1 }
 0x2f7   : > { %1965 = vst [vmem:[%s3109_s7 + $0x68] sm:$0xff] %v2255_v29  ;;  %v1933_v59 = vpop.f32.mrb[45].mxu1 }
 0x2f8   : > { %1964 = vst [vmem:[%s3109_s7 + $0x60] sm:$0xff] %v1933_v59 }
 0x2fa   : > { %v2258_v40 = vpop.f32.mrb[46].mxu1 }
 0x2fb   : > { %1967 = vst [vmem:[%s3109_s7 + $0x78] sm:$0xff] %v2258_v40  ;;  %v1943_v58 = vpop.f32.mrb[47].mxu1 }
 0x2fc   : > { %1966 = vst [vmem:[%s3109_s7 + $0x70] sm:$0xff] %v1943_v58 }
 0x2fd   : > { %s2164_s5 = sshll.u32 %s2856_s22, 1  ;;  %s2170_s14 = sshll.u32 %s2852_s21, 5 }
 0x2fe   : > { %s1982_s11 = sadd.s32 %s2170_s14, %s2164_s5  ;;  %s2001_s26 = sshll.u32 %s3109_s7, 4  ;;  %s2002_s26 = int_to_ptr.vmem [resolvable:$true] %s2001_s26 }
 0x2ff   : > { %s2166_s12 = sshll.u32 %s1982_s11, 7  ;;  %s4302_s18 = sld [smem:[#allocation90_spill]] }
 0x300   : > { %s2885_s30 = smov 256   ;;  %p4303_p9 = scmp.ne.s32.totalorder %s4127_s10, 0 }
 0x301   : > { %s2886_s29 = smov 512   ;;  %s2887_s28 = smov 2  }
 0x302   : > { %2404 = sst [smem:[#allocation19]] (%p4303_p9), %s2885_s30  ;;  %s2888_s21 = smov 128  }
 0x303   : > { %2405 = sst [smem:[#allocation19 + $0x1]] (%p4303_p9), %s2886_s29  ;;  %s2889_s22 = smov 8  }
 0x304   : > { %2406 = sst [smem:[#allocation19 + $0x2]] (%p4303_p9), %s2887_s28  ;;  %s2890_s7 = smov [#allocation18]  }
 0x305   : > { %s1984_s13 = scalar_lea.hbm %s4302_s18, %s2166_s12  ;;  %2407 = sst [smem:[#allocation19 + $0x3]] (%p4303_p9), %s2888_s21 }
 0x306   : > { %2408 = sst [smem:[#allocation19 + $0x4]] (%p4303_p9), %s2888_s21  ;;  %s2891_s8 = smov 0  }
 0x307   : > { %2409 = sst [smem:[#allocation19 + $0x5]] (%p4303_p9), %s2889_s22 }
 0x308   : > { %2410 = dma.general (%p4303_p9), %s2002_s26, 2048, %s1984_s13, %s1969_s16, %s2890_s7, [#allocation19], %s2891_s8, 0  }
 0x309 PF: > { %s4304_s9 = sld [smem:[#allocation24_spill]]  ;;  %s4305_s15 = sld [smem:[#allocation27_spill]] }
 0x30a   : > { %p2427_p2 = scmp.ge.s32.totalorder %s2868_s25, 2 }
 0x30f   : > { %s2029_s6 = sand.u32 1, %s4304_s9   ;;  %p4306_p5 = scmp.ne.s32.totalorder %s4305_s15, 0 }
 0x310   : > { %s2030_s5 = scalar_lea.sflag [#allocation11], %s2029_s6 }
 0x311   : > { %p2420_p10 = pnand %p2427_p2, %p4306_p5 }
 0x313   : > { %2835 = dma.done.wait (!%p2420_p10), %s2030_s5, 2048  }
 0x314   : > { %2837 = vsyncadd (!%p2420_p10), %s2030_s5, 4294965248  ;;  %s22_s25 = sadd.s32 1, %s2868_s25   ;;  %s4307_s14 = sld [smem:[#allocation28_spill]] }
 0x315   : > { %p19_p11 = scmp.ge.s32.totalorder %s22_s25, 8   ;;  %s4308_s10 = sld [smem:[#allocation25_spill]] }
 0x316   : > { %s4309_s16 = sld [smem:[#allocation26_spill]]  ;;  %s4310_s18 = smov %s2844_s19 }
 0x317   : > { %s4311_s19 = smov %s2848_s20  ;;  %s4313_s21 = smov %s2860_s23 }
 0x318   : > { %s4314_s22 = smov %s2864_s24  ;;  %21 = sbr.rel (!%p19_p11) target bundleno = 10 (0xa), region = 121 }
 0x31a   : > { %s4312_s20 = smov %s4307_s14 }
 0x31b   : > { %s4315_s23 = smov %s4308_s10 }
 0x31c   : > { %s4316_s24 = smov %s4309_s16 }
 0x31f   :  { %2035 = vsyncpa [#allocation10], 1 }
 0x320   :  { %2037 = vsyncpa [#allocation10 + $0x1], 1 }
 0x321   :  { %2038 = vsyncpa [#allocation13], 1 }
 0x322   :  { %2039 = vsyncpa [#allocation11], 1 }
 0x323   :  { %2041 = vsyncpa [#allocation11 + $0x1], 1 }

</bundles_post_ra>
